<compile_context>
chip_gen: v7x
topology: tpu7x:2x2x1
jax: 0.10.0
libtpu: 0.0.40
codegen_flags: <defaults>
</compile_context>

<pallas_src>
import functools

import jax
import jax.numpy as jnp
from jax import lax
from jax.experimental import pallas as pl
from jax.experimental.pallas import tpu as pltpu


def _round_up(x, m):
    return ((x + m - 1) // m) * m


def _lstm_chunk_kernel(emb_ref, wih_ref, whh_ref, b_ref, wfc_ref, bfc_ref,
                       out_ref, h_ref, c_ref, gin_ref, hs_ref, *, n_tags):
    """One grid step processes a chunk of Tc time steps.

    emb_ref : (Tc, B, E)   time-major embedding chunk (auto-pipelined into VMEM)
    wih_ref : (E, 4H)      input->gates weight (PyTorch gate order i|f|g|o)
    whh_ref : (H, 4H)      hidden->gates weight
    b_ref   : (1, 4H)      fused bias (b_ih + b_hh)
    wfc_ref : (H, TP)      FC weight, tag dim zero-padded to TP (multiple of 128)
    bfc_ref : (1, TP)      FC bias, tag dim zero-padded
    out_ref : (B, Tc, TP)  batch-major per-token log-probs (padded lanes are junk)
    h_ref/c_ref : (B, H)   LSTM state, persists across grid steps (scratch)
    gin_ref : (Tc, B, 4H)  staged input projection for the chunk (scratch)
    hs_ref  : (Tc, B, H)   per-step hidden outputs for the chunk (scratch)
    """
    Tc, B, E = emb_ref.shape
    H = h_ref.shape[1]
    TP = wfc_ref.shape[1]

    @pl.when(pl.program_id(0) == 0)
    def _():
        h_ref[...] = jnp.zeros_like(h_ref)
        c_ref[...] = jnp.zeros_like(c_ref)

    # Input projection for the whole chunk as ONE batched MXU matmul (bias folded in),
    # staged in VMEM so the recurrence reads one (B, 4H) slab per step.
    gin_ref[...] = (
        jnp.dot(emb_ref[...].reshape(Tc * B, E), wih_ref[...],
                preferred_element_type=jnp.float32)
        + b_ref[...]
    ).reshape(Tc, B, 4 * H)

    w_hh = whh_ref[...]

    def step(t, carry):
        h, c = carry
        # Only the recurrent matmul + activations remain on the serial critical path.
        gates = gin_ref[t] + jnp.dot(h, w_hh, preferred_element_type=jnp.float32)
        i_g = jax.nn.sigmoid(gates[:, 0 * H:1 * H])
        f_g = jax.nn.sigmoid(gates[:, 1 * H:2 * H])
        g_g = jnp.tanh(gates[:, 2 * H:3 * H])
        o_g = jax.nn.sigmoid(gates[:, 3 * H:4 * H])
        c_new = f_g * c + i_g * g_g
        h_new = o_g * jnp.tanh(c_new)
        hs_ref[t] = h_new                      # dense VMEM store, FC hoisted out
        return h_new, c_new

    h_fin, c_fin = lax.fori_loop(0, Tc, step, (h_ref[...], c_ref[...]),
                                 unroll=min(8, Tc))
    h_ref[...] = h_fin
    c_ref[...] = c_fin

    # Hoisted FC + log_softmax: one (Tc*B, H) @ (H, TP) MXU matmul, batched reductions.
    hs = hs_ref[...].reshape(Tc * B, H)
    scores = (jnp.dot(hs, wfc_ref[...], preferred_element_type=jnp.float32)
              + bfc_ref[...])
    # Mask the padded tag lanes explicitly (robust, no -inf/NaN even if dtypes change).
    lane_mask = lax.broadcasted_iota(jnp.int32, scores.shape, 1) < n_tags
    scores = jnp.where(lane_mask, scores, jnp.finfo(jnp.float32).min)
    m = jnp.max(scores, axis=1, keepdims=True)
    shifted = scores - m
    lse = jnp.log(jnp.sum(jnp.exp(shifted), axis=1, keepdims=True))
    logp = (shifted - lse).reshape(Tc, B, TP)

    # Emit batch-major output with dense per-row chunk stores (removes the wrapper-side
    # full-tensor transpose; avoids an in-kernel major-dim transpose).
    for b in range(B):
        out_ref[b] = logp[:, b, :]


def net_forward(x_tokens, params, *, t_chunk=32):
    """x_tokens: int32 (B, T) token ids. Returns float32 (B*T, TAGS) log-probs."""
    emb_table, w_ih, w_hh, b, w_fc, b_fc = params
    B, T = x_tokens.shape
    E = emb_table.shape[1]
    H = w_hh.shape[0]
    TAGS = w_fc.shape[1]
    TP = _round_up(TAGS, 128)                       # lane-dense padded tag dim

    # Pad batch to a sublane multiple; round the chunk to a multiple of 8 and pad T
    # to a chunk multiple (the LSTM is causal, trailing padded steps are discarded).
    B_pad = _round_up(B, 8)
    t_chunk = max(8, min(_round_up(t_chunk, 8), _round_up(T, 8)))
    T_pad = _round_up(T, t_chunk)
    n_chunks = T_pad // t_chunk

    x_pad = jnp.zeros((B_pad, T_pad), x_tokens.dtype).at[:B, :T].set(x_tokens)

    # Glue: embedding gather, produced directly in the kernel's time-major layout so no
    # full-activation transpose happens in XLA.
    # TODO(synk): move the gather fully in-kernel (PrefetchScalarGridSpec token ids +
    # VMEM-resident table / per-chunk row DMA) to avoid materializing (T,B,E) in HBM.
    emb_tbe = jnp.take(emb_table, x_pad.T, axis=0)  # (T_pad, B_pad, E)

    # Lane-pad the FC weight/bias with zeros; the kernel masks padded lanes itself.
    w_fc_p = jnp.zeros((H, TP), jnp.float32).at[:, :TAGS].set(w_fc)
    b_fc_p = jnp.zeros((1, TP), jnp.float32).at[0, :TAGS].set(b_fc)

    # Explicit VMEM budget (matters on v5e's 16 MiB default scoped limit when t_chunk
    # is large); double-buffered pipelined tiles + weights + persistent scratch.
    f32b = 4
    tile_in = t_chunk * B_pad * E * f32b
    tile_out = B_pad * t_chunk * TP * f32b
    weights = (E * 4 * H + H * 4 * H + 4 * H + H * TP + TP) * f32b
    scratch = (2 * B_pad * H + t_chunk * B_pad * 4 * H + t_chunk * B_pad * H) * f32b
    needed = 2 * (tile_in + tile_out) + 2 * weights + scratch
    vmem_limit = int(min(100 * 1024 * 1024, max(32 * 1024 * 1024, 2 * needed)))

    kernel = functools.partial(_lstm_chunk_kernel, n_tags=TAGS)

    out = pl.pallas_call(
        kernel,
        out_shape=jax.ShapeDtypeStruct((B_pad, T_pad, TP), jnp.float32),
        grid_spec=pltpu.PrefetchScalarGridSpec(
            num_scalar_prefetch=0,
            grid=(n_chunks,),
            in_specs=[
                pl.BlockSpec((t_chunk, B_pad, E), lambda i: (i, 0, 0)),   # emb chunk
                pl.BlockSpec((E, 4 * H), lambda i: (0, 0)),               # W_ih
                pl.BlockSpec((H, 4 * H), lambda i: (0, 0)),               # W_hh
                pl.BlockSpec((1, 4 * H), lambda i: (0, 0)),               # bias
                pl.BlockSpec((H, TP), lambda i: (0, 0)),                  # W_fc (padded)
                pl.BlockSpec((1, TP), lambda i: (0, 0)),                  # b_fc (padded)
            ],
            out_specs=pl.BlockSpec((B_pad, t_chunk, TP), lambda i: (0, i, 0)),
            scratch_shapes=[
                pltpu.VMEM((B_pad, H), jnp.float32),              # h (carried)
                pltpu.VMEM((B_pad, H), jnp.float32),              # c (carried)
                pltpu.VMEM((t_chunk, B_pad, 4 * H), jnp.float32),  # staged x@W_ih + b
                pltpu.VMEM((t_chunk, B_pad, H), jnp.float32),      # per-chunk h_t
            ],
        ),
        compiler_params=pltpu.CompilerParams(
            dimension_semantics=("arbitrary",),    # sequential recurrence over chunks
            vmem_limit_bytes=vmem_limit),
    )(emb_tbe, w_ih, w_hh, b.reshape(1, -1), w_fc_p, b_fc_p)

    # Drop batch/time/tag padding and flatten exactly like PyTorch's .view(-1, H).
    return out[:B, :T, :TAGS].reshape(B * T, TAGS)


def net_forward_ref(x_tokens, params):
    """Pure-JAX reference replicating nn.Embedding + nn.LSTM(batch_first) + Linear + log_softmax."""
    emb_table, w_ih, w_hh, b, w_fc, b_fc = params
    B, T = x_tokens.shape
    H = w_hh.shape[0]
    emb = jnp.take(emb_table, x_tokens, axis=0)            # (B, T, E)

    def step(carry, x_t):
        h, c = carry
        gates = x_t @ w_ih + h @ w_hh + b
        i_g = jax.nn.sigmoid(gates[:, 0 * H:1 * H])
        f_g = jax.nn.sigmoid(gates[:, 1 * H:2 * H])
        g_g = jnp.tanh(gates[:, 2 * H:3 * H])
        o_g = jax.nn.sigmoid(gates[:, 3 * H:4 * H])
        c_new = f_g * c + i_g * g_g
        h_new = o_g * jnp.tanh(c_new)
        return (h_new, c_new), h_new

    h0 = jnp.zeros((B, H), jnp.float32)
    (_, _), hs = lax.scan(step, (h0, h0), jnp.transpose(emb, (1, 0, 2)))  # (T, B, H)
    outputs = jnp.transpose(hs, (1, 0, 2)).reshape(B * T, H)
    scores = outputs @ w_fc + b_fc
    return jax.nn.log_softmax(scores, axis=1)


def _make_params(key, word_vocab, embed_dim, hidden, tag_vocab):
    k_emb, k_wih, k_whh, k_b, k_wfc, k_bfc = jax.random.split(key, 6)
    emb_table = 0.1 * jax.random.normal(k_emb, (word_vocab, embed_dim), jnp.float32)
    w_ih = 0.1 * jax.random.normal(k_wih, (embed_dim, 4 * hidden), jnp.float32)
    w_hh = 0.1 * jax.random.normal(k_whh, (hidden, 4 * hidden), jnp.float32)
    b = 0.1 * jax.random.normal(k_b, (4 * hidden,), jnp.float32)
    w_fc = 0.1 * jax.random.normal(k_wfc, (hidden, tag_vocab), jnp.float32)
    b_fc = 0.1 * jax.random.normal(k_bfc, (tag_vocab,), jnp.float32)
    return (emb_table, w_ih, w_hh, b, w_fc, b_fc)


if __name__ == "__main__":
    # Small, forward-consistent sizes (PyTorch gate order i|f|g|o; weights stored
    # pre-transposed: W_ih (E, 4H), W_hh (H, 4H); bias = b_ih + b_hh folded).
    WORD_VOCAB = 32
    EMBED_DIM = 16
    HIDDEN = 32
    TAG_VOCAB = 8

    key = jax.random.PRNGKey(0)
    k_params, k_x1, k_x2 = jax.random.split(key, 3)
    params = _make_params(k_params, WORD_VOCAB, EMBED_DIM, HIDDEN, TAG_VOCAB)

    # Test 1: the canonical small case (B=2, T=8).
    B, T = 2, 8
    x = jax.random.randint(k_x1, (B, T), 0, WORD_VOCAB, dtype=jnp.int32)
    out = jax.block_until_ready(net_forward(x, params, t_chunk=32))
    ref = jax.block_until_ready(net_forward_ref(x, params))
    assert out.shape == (B * T, TAG_VOCAB), out.shape
    assert jnp.allclose(out, ref, atol=1e-4, rtol=1e-4), float(jnp.max(jnp.abs(out - ref)))
    assert jnp.allclose(jnp.sum(jnp.exp(out), axis=1), 1.0, atol=1e-4)

    # Test 2: ragged sizes exercising the batch/time padding paths (B=3, T=5).
    B2, T2 = 3, 5
    x2 = jax.random.randint(k_x2, (B2, T2), 0, WORD_VOCAB, dtype=jnp.int32)
    out2 = jax.block_until_ready(net_forward(x2, params, t_chunk=32))
    ref2 = jax.block_until_ready(net_forward_ref(x2, params))
    assert out2.shape == (B2 * T2, TAG_VOCAB), out2.shape
    assert jnp.allclose(out2, ref2, atol=1e-4, rtol=1e-4), float(jnp.max(jnp.abs(out2 - ref2)))

    print("KERNEL_OK")
</pallas_src>

<mosaic_0001>
module attributes {stable_mosaic.version = 11 : i64} {
  func.func @_lstm_chunk_kernel(%arg0: i32, %arg1: memref<8x8x16xf32, #tpu.memory_space<vmem>>, %arg2: memref<16x128xf32, #tpu.memory_space<vmem>>, %arg3: memref<32x128xf32, #tpu.memory_space<vmem>>, %arg4: memref<1x128xf32, #tpu.memory_space<vmem>>, %arg5: memref<32x128xf32, #tpu.memory_space<vmem>>, %arg6: memref<1x128xf32, #tpu.memory_space<vmem>>, %arg7: memref<8x8x128xf32, #tpu.memory_space<vmem>>, %arg8: memref<8x32xf32, #tpu.memory_space<vmem>>, %arg9: memref<8x32xf32, #tpu.memory_space<vmem>>, %arg10: memref<8x8x128xf32, #tpu.memory_space<vmem>>, %arg11: memref<8x8x32xf32, #tpu.memory_space<vmem>>) attributes {dimension_semantics = [#tpu.dimension_semantics<arbitrary>], iteration_bounds = array<i64: 1>, scalar_prefetch = 0 : i64, scratch_operands = 4 : i64, tpu.core_type = #tpu.core_type<tc>, window_params = [{transform_indices = @transform_0, window_bounds = array<i64: 8, 8, 16>}, {pipeline_mode = #tpu.pipeline_mode<synchronous>, transform_indices = @transform_1, window_bounds = array<i64: 16, 128>}, {pipeline_mode = #tpu.pipeline_mode<synchronous>, transform_indices = @transform_2, window_bounds = array<i64: 32, 128>}, {pipeline_mode = #tpu.pipeline_mode<synchronous>, transform_indices = @transform_3, window_bounds = array<i64: 1, 128>}, {pipeline_mode = #tpu.pipeline_mode<synchronous>, transform_indices = @transform_4, window_bounds = array<i64: 32, 128>}, {pipeline_mode = #tpu.pipeline_mode<synchronous>, transform_indices = @transform_5, window_bounds = array<i64: 1, 128>}, {transform_indices = @transform_6, window_bounds = array<i64: 8, 8, 128>}]} {
    %c0_i32 = arith.constant 0 : i32
    %0 = arith.cmpi eq, %arg0, %c0_i32 : i32
    %1 = arith.extui %0 : i1 to i32
    %c0_i32_0 = arith.constant 0 : i32
    %2 = arith.cmpi ne, %1, %c0_i32_0 : i32
    scf.if %2 {
      %cst_114 = arith.constant 0.000000e+00 : f32
      %352 = vector.broadcast %cst_114 : f32 to vector<8x32xf32>
      %c0_115 = arith.constant 0 : index
      %c0_116 = arith.constant 0 : index
      %353 = vector.load %arg8[%c0_115, %c0_116] : memref<8x32xf32, #tpu.memory_space<vmem>>, vector<8x32xf32>
      tpu.vector_store %arg8[%c0_115, %c0_116], %352 {strides = array<i32>} : memref<8x32xf32, #tpu.memory_space<vmem>>, vector<8x32xf32>,
      %cst_117 = arith.constant 0.000000e+00 : f32
      %354 = vector.broadcast %cst_117 : f32 to vector<8x32xf32>
      %c0_118 = arith.constant 0 : index
      %c0_119 = arith.constant 0 : index
      %355 = vector.load %arg9[%c0_118, %c0_119] : memref<8x32xf32, #tpu.memory_space<vmem>>, vector<8x32xf32>
      tpu.vector_store %arg9[%c0_118, %c0_119], %354 {strides = array<i32>} : memref<8x32xf32, #tpu.memory_space<vmem>>, vector<8x32xf32>,
    } else {
    }
    %c0 = arith.constant 0 : index
    %c0_1 = arith.constant 0 : index
    %c0_2 = arith.constant 0 : index
    %3 = vector.load %arg1[%c0, %c0_1, %c0_2] : memref<8x8x16xf32, #tpu.memory_space<vmem>>, vector<8x8x16xf32>
    %4 = vector.shape_cast %3 : vector<8x8x16xf32> to vector<64x16xf32>
    %c0_3 = arith.constant 0 : index
    %c0_4 = arith.constant 0 : index
    %5 = vector.load %arg2[%c0_3, %c0_4] : memref<16x128xf32, #tpu.memory_space<vmem>>, vector<16x128xf32>
    %cst = arith.constant dense<0.000000e+00> : vector<64x128xf32>
    %6 = tpu.matmul %4, %5, %cst {dimension_numbers = #tpu.dot_dimension_numbers<[1], [0], [0], [1], [0, 0, 1, 1], [], []>} : vector<64x16xf32>, vector<16x128xf32>, vector<64x128xf32> -> vector<64x128xf32>
    %c0_5 = arith.constant 0 : index
    %c0_6 = arith.constant 0 : index
    %7 = vector.load %arg4[%c0_5, %c0_6] : memref<1x128xf32, #tpu.memory_space<vmem>>, vector<1x128xf32>
    %8 = vector.broadcast %7 : vector<1x128xf32> to vector<64x128xf32>
    %9 = arith.addf %6, %8 : vector<64x128xf32>
    %10 = vector.shape_cast %9 : vector<64x128xf32> to vector<8x8x128xf32>
    %c0_7 = arith.constant 0 : index
    %c0_8 = arith.constant 0 : index
    %c0_9 = arith.constant 0 : index
    %11 = vector.load %arg10[%c0_7, %c0_8, %c0_9] : memref<8x8x128xf32, #tpu.memory_space<vmem>>, vector<8x8x128xf32>
    tpu.vector_store %arg10[%c0_7, %c0_8, %c0_9], %10 {strides = array<i32>} : memref<8x8x128xf32, #tpu.memory_space<vmem>>, vector<8x8x128xf32>,
    %c0_10 = arith.constant 0 : index
    %c0_11 = arith.constant 0 : index
    %12 = vector.load %arg3[%c0_10, %c0_11] : memref<32x128xf32, #tpu.memory_space<vmem>>, vector<32x128xf32>
    %c0_12 = arith.constant 0 : index
    %c0_13 = arith.constant 0 : index
    %13 = vector.load %arg8[%c0_12, %c0_13] : memref<8x32xf32, #tpu.memory_space<vmem>>, vector<8x32xf32>
    %c0_14 = arith.constant 0 : index
    %c0_15 = arith.constant 0 : index
    %14 = vector.load %arg9[%c0_14, %c0_15] : memref<8x32xf32, #tpu.memory_space<vmem>>, vector<8x32xf32>
    %c0_i32_16 = arith.constant 0 : i32
    %15 = arith.index_cast %c0_i32_16 : i32 to index
    %c0_17 = arith.constant 0 : index
    %c0_18 = arith.constant 0 : index
    %16 = vector.load %arg10[%15, %c0_17, %c0_18] : memref<8x8x128xf32, #tpu.memory_space<vmem>>, vector<1x8x128xf32>
    %17 = vector.shape_cast %16 : vector<1x8x128xf32> to vector<8x128xf32>
    %cst_19 = arith.constant dense<0.000000e+00> : vector<8x128xf32>
    %18 = tpu.matmul %13, %12, %cst_19 {dimension_numbers = #tpu.dot_dimension_numbers<[1], [0], [0], [1], [0, 0, 1, 1], [], []>} : vector<8x32xf32>, vector<32x128xf32>, vector<8x128xf32> -> vector<8x128xf32>
    %19 = arith.addf %17, %18 : vector<8x128xf32>
    %20 = vector.extract_strided_slice %19 {offsets = [0, 0], sizes = [8, 32], strides = [1, 1]} : vector<8x128xf32> to vector<8x32xf32>
    %21 = arith.negf %20 : vector<8x32xf32>
    %22 = math.exp %21 : vector<8x32xf32>
    %cst_20 = arith.constant 1.000000e+00 : f32
    %23 = vector.broadcast %cst_20 : f32 to vector<8x32xf32>
    %24 = arith.addf %23, %22 : vector<8x32xf32>
    %25 = arith.divf %23, %24 : vector<8x32xf32>
    %26 = vector.extract_strided_slice %19 {offsets = [0, 32], sizes = [8, 32], strides = [1, 1]} : vector<8x128xf32> to vector<8x32xf32>
    %27 = arith.negf %26 : vector<8x32xf32>
    %28 = math.exp %27 : vector<8x32xf32>
    %cst_21 = arith.constant 1.000000e+00 : f32
    %29 = vector.broadcast %cst_21 : f32 to vector<8x32xf32>
    %30 = arith.addf %29, %28 : vector<8x32xf32>
    %31 = arith.divf %29, %30 : vector<8x32xf32>
    %32 = vector.extract_strided_slice %19 {offsets = [0, 64], sizes = [8, 32], strides = [1, 1]} : vector<8x128xf32> to vector<8x32xf32>
    %33 = math.tanh %32 : vector<8x32xf32>
    %34 = vector.extract_strided_slice %19 {offsets = [0, 96], sizes = [8, 32], strides = [1, 1]} : vector<8x128xf32> to vector<8x32xf32>
    %35 = arith.negf %34 : vector<8x32xf32>
    %36 = math.exp %35 : vector<8x32xf32>
    %cst_22 = arith.constant 1.000000e+00 : f32
    %37 = vector.broadcast %cst_22 : f32 to vector<8x32xf32>
    %38 = arith.addf %37, %36 : vector<8x32xf32>
    %39 = arith.divf %37, %38 : vector<8x32xf32>
    %40 = arith.mulf %31, %14 : vector<8x32xf32>
    %41 = arith.mulf %25, %33 : vector<8x32xf32>
    %42 = arith.addf %40, %41 : vector<8x32xf32>
    %43 = math.tanh %42 : vector<8x32xf32>
    %44 = arith.mulf %39, %43 : vector<8x32xf32>
    %45 = arith.index_cast %c0_i32_16 : i32 to index
    %c0_23 = arith.constant 0 : index
    %c0_24 = arith.constant 0 : index
    %46 = vector.load %arg11[%45, %c0_23, %c0_24] : memref<8x8x32xf32, #tpu.memory_space<vmem>>, vector<1x8x32xf32>
    %47 = vector.shape_cast %46 : vector<1x8x32xf32> to vector<8x32xf32>
    %48 = vector.shape_cast %44 : vector<8x32xf32> to vector<1x8x32xf32>
    tpu.vector_store %arg11[%45, %c0_23, %c0_24], %48 {strides = array<i32>} : memref<8x8x32xf32, #tpu.memory_space<vmem>>, vector<1x8x32xf32>,
    %c1_i32 = arith.constant 1 : i32
    %49 = arith.index_cast %c1_i32 : i32 to index
    %c0_25 = arith.constant 0 : index
    %c0_26 = arith.constant 0 : index
    %50 = vector.load %arg10[%49, %c0_25, %c0_26] : memref<8x8x128xf32, #tpu.memory_space<vmem>>, vector<1x8x128xf32>
    %51 = vector.shape_cast %50 : vector<1x8x128xf32> to vector<8x128xf32>
    %cst_27 = arith.constant dense<0.000000e+00> : vector<8x128xf32>
    %52 = tpu.matmul %44, %12, %cst_27 {dimension_numbers = #tpu.dot_dimension_numbers<[1], [0], [0], [1], [0, 0, 1, 1], [], []>} : vector<8x32xf32>, vector<32x128xf32>, vector<8x128xf32> -> vector<8x128xf32>
    %53 = arith.addf %51, %52 : vector<8x128xf32>
    %54 = vector.extract_strided_slice %53 {offsets = [0, 0], sizes = [8, 32], strides = [1, 1]} : vector<8x128xf32> to vector<8x32xf32>
    %55 = arith.negf %54 : vector<8x32xf32>
    %56 = math.exp %55 : vector<8x32xf32>
    %cst_28 = arith.constant 1.000000e+00 : f32
    %57 = vector.broadcast %cst_28 : f32 to vector<8x32xf32>
    %58 = arith.addf %57, %56 : vector<8x32xf32>
    %59 = arith.divf %57, %58 : vector<8x32xf32>
    %60 = vector.extract_strided_slice %53 {offsets = [0, 32], sizes = [8, 32], strides = [1, 1]} : vector<8x128xf32> to vector<8x32xf32>
    %61 = arith.negf %60 : vector<8x32xf32>
    %62 = math.exp %61 : vector<8x32xf32>
    %cst_29 = arith.constant 1.000000e+00 : f32
    %63 = vector.broadcast %cst_29 : f32 to vector<8x32xf32>
    %64 = arith.addf %63, %62 : vector<8x32xf32>
    %65 = arith.divf %63, %64 : vector<8x32xf32>
    %66 = vector.extract_strided_slice %53 {offsets = [0, 64], sizes = [8, 32], strides = [1, 1]} : vector<8x128xf32> to vector<8x32xf32>
    %67 = math.tanh %66 : vector<8x32xf32>
    %68 = vector.extract_strided_slice %53 {offsets = [0, 96], sizes = [8, 32], strides = [1, 1]} : vector<8x128xf32> to vector<8x32xf32>
    %69 = arith.negf %68 : vector<8x32xf32>
    %70 = math.exp %69 : vector<8x32xf32>
    %cst_30 = arith.constant 1.000000e+00 : f32
    %71 = vector.broadcast %cst_30 : f32 to vector<8x32xf32>
    %72 = arith.addf %71, %70 : vector<8x32xf32>
    %73 = arith.divf %71, %72 : vector<8x32xf32>
    %74 = arith.mulf %65, %42 : vector<8x32xf32>
    %75 = arith.mulf %59, %67 : vector<8x32xf32>
    %76 = arith.addf %74, %75 : vector<8x32xf32>
    %77 = math.tanh %76 : vector<8x32xf32>
    %78 = arith.mulf %73, %77 : vector<8x32xf32>
    %79 = arith.index_cast %c1_i32 : i32 to index
    %c0_31 = arith.constant 0 : index
    %c0_32 = arith.constant 0 : index
    %80 = vector.load %arg11[%79, %c0_31, %c0_32] : memref<8x8x32xf32, #tpu.memory_space<vmem>>, vector<1x8x32xf32>
    %81 = vector.shape_cast %80 : vector<1x8x32xf32> to vector<8x32xf32>
    %82 = vector.shape_cast %78 : vector<8x32xf32> to vector<1x8x32xf32>
    tpu.vector_store %arg11[%79, %c0_31, %c0_32], %82 {strides = array<i32>} : memref<8x8x32xf32, #tpu.memory_space<vmem>>, vector<1x8x32xf32>,
    %c2_i32 = arith.constant 2 : i32
    %83 = arith.index_cast %c2_i32 : i32 to index
    %c0_33 = arith.constant 0 : index
    %c0_34 = arith.constant 0 : index
    %84 = vector.load %arg10[%83, %c0_33, %c0_34] : memref<8x8x128xf32, #tpu.memory_space<vmem>>, vector<1x8x128xf32>
    %85 = vector.shape_cast %84 : vector<1x8x128xf32> to vector<8x128xf32>
    %cst_35 = arith.constant dense<0.000000e+00> : vector<8x128xf32>
    %86 = tpu.matmul %78, %12, %cst_35 {dimension_numbers = #tpu.dot_dimension_numbers<[1], [0], [0], [1], [0, 0, 1, 1], [], []>} : vector<8x32xf32>, vector<32x128xf32>, vector<8x128xf32> -> vector<8x128xf32>
    %87 = arith.addf %85, %86 : vector<8x128xf32>
    %88 = vector.extract_strided_slice %87 {offsets = [0, 0], sizes = [8, 32], strides = [1, 1]} : vector<8x128xf32> to vector<8x32xf32>
    %89 = arith.negf %88 : vector<8x32xf32>
    %90 = math.exp %89 : vector<8x32xf32>
    %cst_36 = arith.constant 1.000000e+00 : f32
    %91 = vector.broadcast %cst_36 : f32 to vector<8x32xf32>
    %92 = arith.addf %91, %90 : vector<8x32xf32>
    %93 = arith.divf %91, %92 : vector<8x32xf32>
    %94 = vector.extract_strided_slice %87 {offsets = [0, 32], sizes = [8, 32], strides = [1, 1]} : vector<8x128xf32> to vector<8x32xf32>
    %95 = arith.negf %94 : vector<8x32xf32>
    %96 = math.exp %95 : vector<8x32xf32>
    %cst_37 = arith.constant 1.000000e+00 : f32
    %97 = vector.broadcast %cst_37 : f32 to vector<8x32xf32>
    %98 = arith.addf %97, %96 : vector<8x32xf32>
    %99 = arith.divf %97, %98 : vector<8x32xf32>
    %100 = vector.extract_strided_slice %87 {offsets = [0, 64], sizes = [8, 32], strides = [1, 1]} : vector<8x128xf32> to vector<8x32xf32>
    %101 = math.tanh %100 : vector<8x32xf32>
    %102 = vector.extract_strided_slice %87 {offsets = [0, 96], sizes = [8, 32], strides = [1, 1]} : vector<8x128xf32> to vector<8x32xf32>
    %103 = arith.negf %102 : vector<8x32xf32>
    %104 = math.exp %103 : vector<8x32xf32>
    %cst_38 = arith.constant 1.000000e+00 : f32
    %105 = vector.broadcast %cst_38 : f32 to vector<8x32xf32>
    %106 = arith.addf %105, %104 : vector<8x32xf32>
    %107 = arith.divf %105, %106 : vector<8x32xf32>
    %108 = arith.mulf %99, %76 : vector<8x32xf32>
    %109 = arith.mulf %93, %101 : vector<8x32xf32>
    %110 = arith.addf %108, %109 : vector<8x32xf32>
    %111 = math.tanh %110 : vector<8x32xf32>
    %112 = arith.mulf %107, %111 : vector<8x32xf32>
    %113 = arith.index_cast %c2_i32 : i32 to index
    %c0_39 = arith.constant 0 : index
    %c0_40 = arith.constant 0 : index
    %114 = vector.load %arg11[%113, %c0_39, %c0_40] : memref<8x8x32xf32, #tpu.memory_space<vmem>>, vector<1x8x32xf32>
    %115 = vector.shape_cast %114 : vector<1x8x32xf32> to vector<8x32xf32>
    %116 = vector.shape_cast %112 : vector<8x32xf32> to vector<1x8x32xf32>
    tpu.vector_store %arg11[%113, %c0_39, %c0_40], %116 {strides = array<i32>} : memref<8x8x32xf32, #tpu.memory_space<vmem>>, vector<1x8x32xf32>,
    %c3_i32 = arith.constant 3 : i32
    %117 = arith.index_cast %c3_i32 : i32 to index
    %c0_41 = arith.constant 0 : index
    %c0_42 = arith.constant 0 : index
    %118 = vector.load %arg10[%117, %c0_41, %c0_42] : memref<8x8x128xf32, #tpu.memory_space<vmem>>, vector<1x8x128xf32>
    %119 = vector.shape_cast %118 : vector<1x8x128xf32> to vector<8x128xf32>
    %cst_43 = arith.constant dense<0.000000e+00> : vector<8x128xf32>
    %120 = tpu.matmul %112, %12, %cst_43 {dimension_numbers = #tpu.dot_dimension_numbers<[1], [0], [0], [1], [0, 0, 1, 1], [], []>} : vector<8x32xf32>, vector<32x128xf32>, vector<8x128xf32> -> vector<8x128xf32>
    %121 = arith.addf %119, %120 : vector<8x128xf32>
    %122 = vector.extract_strided_slice %121 {offsets = [0, 0], sizes = [8, 32], strides = [1, 1]} : vector<8x128xf32> to vector<8x32xf32>
    %123 = arith.negf %122 : vector<8x32xf32>
    %124 = math.exp %123 : vector<8x32xf32>
    %cst_44 = arith.constant 1.000000e+00 : f32
    %125 = vector.broadcast %cst_44 : f32 to vector<8x32xf32>
    %126 = arith.addf %125, %124 : vector<8x32xf32>
    %127 = arith.divf %125, %126 : vector<8x32xf32>
    %128 = vector.extract_strided_slice %121 {offsets = [0, 32], sizes = [8, 32], strides = [1, 1]} : vector<8x128xf32> to vector<8x32xf32>
    %129 = arith.negf %128 : vector<8x32xf32>
    %130 = math.exp %129 : vector<8x32xf32>
    %cst_45 = arith.constant 1.000000e+00 : f32
    %131 = vector.broadcast %cst_45 : f32 to vector<8x32xf32>
    %132 = arith.addf %131, %130 : vector<8x32xf32>
    %133 = arith.divf %131, %132 : vector<8x32xf32>
    %134 = vector.extract_strided_slice %121 {offsets = [0, 64], sizes = [8, 32], strides = [1, 1]} : vector<8x128xf32> to vector<8x32xf32>
    %135 = math.tanh %134 : vector<8x32xf32>
    %136 = vector.extract_strided_slice %121 {offsets = [0, 96], sizes = [8, 32], strides = [1, 1]} : vector<8x128xf32> to vector<8x32xf32>
    %137 = arith.negf %136 : vector<8x32xf32>
    %138 = math.exp %137 : vector<8x32xf32>
    %cst_46 = arith.constant 1.000000e+00 : f32
    %139 = vector.broadcast %cst_46 : f32 to vector<8x32xf32>
    %140 = arith.addf %139, %138 : vector<8x32xf32>
    %141 = arith.divf %139, %140 : vector<8x32xf32>
    %142 = arith.mulf %133, %110 : vector<8x32xf32>
    %143 = arith.mulf %127, %135 : vector<8x32xf32>
    %144 = arith.addf %142, %143 : vector<8x32xf32>
    %145 = math.tanh %144 : vector<8x32xf32>
    %146 = arith.mulf %141, %145 : vector<8x32xf32>
    %147 = arith.index_cast %c3_i32 : i32 to index
    %c0_47 = arith.constant 0 : index
    %c0_48 = arith.constant 0 : index
    %148 = vector.load %arg11[%147, %c0_47, %c0_48] : memref<8x8x32xf32, #tpu.memory_space<vmem>>, vector<1x8x32xf32>
    %149 = vector.shape_cast %148 : vector<1x8x32xf32> to vector<8x32xf32>
    %150 = vector.shape_cast %146 : vector<8x32xf32> to vector<1x8x32xf32>
    tpu.vector_store %arg11[%147, %c0_47, %c0_48], %150 {strides = array<i32>} : memref<8x8x32xf32, #tpu.memory_space<vmem>>, vector<1x8x32xf32>,
    %c4_i32 = arith.constant 4 : i32
    %151 = arith.index_cast %c4_i32 : i32 to index
    %c0_49 = arith.constant 0 : index
    %c0_50 = arith.constant 0 : index
    %152 = vector.load %arg10[%151, %c0_49, %c0_50] : memref<8x8x128xf32, #tpu.memory_space<vmem>>, vector<1x8x128xf32>
    %153 = vector.shape_cast %152 : vector<1x8x128xf32> to vector<8x128xf32>
    %cst_51 = arith.constant dense<0.000000e+00> : vector<8x128xf32>
    %154 = tpu.matmul %146, %12, %cst_51 {dimension_numbers = #tpu.dot_dimension_numbers<[1], [0], [0], [1], [0, 0, 1, 1], [], []>} : vector<8x32xf32>, vector<32x128xf32>, vector<8x128xf32> -> vector<8x128xf32>
    %155 = arith.addf %153, %154 : vector<8x128xf32>
    %156 = vector.extract_strided_slice %155 {offsets = [0, 0], sizes = [8, 32], strides = [1, 1]} : vector<8x128xf32> to vector<8x32xf32>
    %157 = arith.negf %156 : vector<8x32xf32>
    %158 = math.exp %157 : vector<8x32xf32>
    %cst_52 = arith.constant 1.000000e+00 : f32
    %159 = vector.broadcast %cst_52 : f32 to vector<8x32xf32>
    %160 = arith.addf %159, %158 : vector<8x32xf32>
    %161 = arith.divf %159, %160 : vector<8x32xf32>
    %162 = vector.extract_strided_slice %155 {offsets = [0, 32], sizes = [8, 32], strides = [1, 1]} : vector<8x128xf32> to vector<8x32xf32>
    %163 = arith.negf %162 : vector<8x32xf32>
    %164 = math.exp %163 : vector<8x32xf32>
    %cst_53 = arith.constant 1.000000e+00 : f32
    %165 = vector.broadcast %cst_53 : f32 to vector<8x32xf32>
    %166 = arith.addf %165, %164 : vector<8x32xf32>
    %167 = arith.divf %165, %166 : vector<8x32xf32>
    %168 = vector.extract_strided_slice %155 {offsets = [0, 64], sizes = [8, 32], strides = [1, 1]} : vector<8x128xf32> to vector<8x32xf32>
    %169 = math.tanh %168 : vector<8x32xf32>
    %170 = vector.extract_strided_slice %155 {offsets = [0, 96], sizes = [8, 32], strides = [1, 1]} : vector<8x128xf32> to vector<8x32xf32>
    %171 = arith.negf %170 : vector<8x32xf32>
    %172 = math.exp %171 : vector<8x32xf32>
    %cst_54 = arith.constant 1.000000e+00 : f32
    %173 = vector.broadcast %cst_54 : f32 to vector<8x32xf32>
    %174 = arith.addf %173, %172 : vector<8x32xf32>
    %175 = arith.divf %173, %174 : vector<8x32xf32>
    %176 = arith.mulf %167, %144 : vector<8x32xf32>
    %177 = arith.mulf %161, %169 : vector<8x32xf32>
    %178 = arith.addf %176, %177 : vector<8x32xf32>
    %179 = math.tanh %178 : vector<8x32xf32>
    %180 = arith.mulf %175, %179 : vector<8x32xf32>
    %181 = arith.index_cast %c4_i32 : i32 to index
    %c0_55 = arith.constant 0 : index
    %c0_56 = arith.constant 0 : index
    %182 = vector.load %arg11[%181, %c0_55, %c0_56] : memref<8x8x32xf32, #tpu.memory_space<vmem>>, vector<1x8x32xf32>
    %183 = vector.shape_cast %182 : vector<1x8x32xf32> to vector<8x32xf32>
    %184 = vector.shape_cast %180 : vector<8x32xf32> to vector<1x8x32xf32>
    tpu.vector_store %arg11[%181, %c0_55, %c0_56], %184 {strides = array<i32>} : memref<8x8x32xf32, #tpu.memory_space<vmem>>, vector<1x8x32xf32>,
    %c5_i32 = arith.constant 5 : i32
    %185 = arith.index_cast %c5_i32 : i32 to index
    %c0_57 = arith.constant 0 : index
    %c0_58 = arith.constant 0 : index
    %186 = vector.load %arg10[%185, %c0_57, %c0_58] : memref<8x8x128xf32, #tpu.memory_space<vmem>>, vector<1x8x128xf32>
    %187 = vector.shape_cast %186 : vector<1x8x128xf32> to vector<8x128xf32>
    %cst_59 = arith.constant dense<0.000000e+00> : vector<8x128xf32>
    %188 = tpu.matmul %180, %12, %cst_59 {dimension_numbers = #tpu.dot_dimension_numbers<[1], [0], [0], [1], [0, 0, 1, 1], [], []>} : vector<8x32xf32>, vector<32x128xf32>, vector<8x128xf32> -> vector<8x128xf32>
    %189 = arith.addf %187, %188 : vector<8x128xf32>
    %190 = vector.extract_strided_slice %189 {offsets = [0, 0], sizes = [8, 32], strides = [1, 1]} : vector<8x128xf32> to vector<8x32xf32>
    %191 = arith.negf %190 : vector<8x32xf32>
    %192 = math.exp %191 : vector<8x32xf32>
    %cst_60 = arith.constant 1.000000e+00 : f32
    %193 = vector.broadcast %cst_60 : f32 to vector<8x32xf32>
    %194 = arith.addf %193, %192 : vector<8x32xf32>
    %195 = arith.divf %193, %194 : vector<8x32xf32>
    %196 = vector.extract_strided_slice %189 {offsets = [0, 32], sizes = [8, 32], strides = [1, 1]} : vector<8x128xf32> to vector<8x32xf32>
    %197 = arith.negf %196 : vector<8x32xf32>
    %198 = math.exp %197 : vector<8x32xf32>
    %cst_61 = arith.constant 1.000000e+00 : f32
    %199 = vector.broadcast %cst_61 : f32 to vector<8x32xf32>
    %200 = arith.addf %199, %198 : vector<8x32xf32>
    %201 = arith.divf %199, %200 : vector<8x32xf32>
    %202 = vector.extract_strided_slice %189 {offsets = [0, 64], sizes = [8, 32], strides = [1, 1]} : vector<8x128xf32> to vector<8x32xf32>
    %203 = math.tanh %202 : vector<8x32xf32>
    %204 = vector.extract_strided_slice %189 {offsets = [0, 96], sizes = [8, 32], strides = [1, 1]} : vector<8x128xf32> to vector<8x32xf32>
    %205 = arith.negf %204 : vector<8x32xf32>
    %206 = math.exp %205 : vector<8x32xf32>
    %cst_62 = arith.constant 1.000000e+00 : f32
    %207 = vector.broadcast %cst_62 : f32 to vector<8x32xf32>
    %208 = arith.addf %207, %206 : vector<8x32xf32>
    %209 = arith.divf %207, %208 : vector<8x32xf32>
    %210 = arith.mulf %201, %178 : vector<8x32xf32>
    %211 = arith.mulf %195, %203 : vector<8x32xf32>
    %212 = arith.addf %210, %211 : vector<8x32xf32>
    %213 = math.tanh %212 : vector<8x32xf32>
    %214 = arith.mulf %209, %213 : vector<8x32xf32>
    %215 = arith.index_cast %c5_i32 : i32 to index
    %c0_63 = arith.constant 0 : index
    %c0_64 = arith.constant 0 : index
    %216 = vector.load %arg11[%215, %c0_63, %c0_64] : memref<8x8x32xf32, #tpu.memory_space<vmem>>, vector<1x8x32xf32>
    %217 = vector.shape_cast %216 : vector<1x8x32xf32> to vector<8x32xf32>
    %218 = vector.shape_cast %214 : vector<8x32xf32> to vector<1x8x32xf32>
    tpu.vector_store %arg11[%215, %c0_63, %c0_64], %218 {strides = array<i32>} : memref<8x8x32xf32, #tpu.memory_space<vmem>>, vector<1x8x32xf32>,
    %c6_i32 = arith.constant 6 : i32
    %219 = arith.index_cast %c6_i32 : i32 to index
    %c0_65 = arith.constant 0 : index
    %c0_66 = arith.constant 0 : index
    %220 = vector.load %arg10[%219, %c0_65, %c0_66] : memref<8x8x128xf32, #tpu.memory_space<vmem>>, vector<1x8x128xf32>
    %221 = vector.shape_cast %220 : vector<1x8x128xf32> to vector<8x128xf32>
    %cst_67 = arith.constant dense<0.000000e+00> : vector<8x128xf32>
    %222 = tpu.matmul %214, %12, %cst_67 {dimension_numbers = #tpu.dot_dimension_numbers<[1], [0], [0], [1], [0, 0, 1, 1], [], []>} : vector<8x32xf32>, vector<32x128xf32>, vector<8x128xf32> -> vector<8x128xf32>
    %223 = arith.addf %221, %222 : vector<8x128xf32>
    %224 = vector.extract_strided_slice %223 {offsets = [0, 0], sizes = [8, 32], strides = [1, 1]} : vector<8x128xf32> to vector<8x32xf32>
    %225 = arith.negf %224 : vector<8x32xf32>
    %226 = math.exp %225 : vector<8x32xf32>
    %cst_68 = arith.constant 1.000000e+00 : f32
    %227 = vector.broadcast %cst_68 : f32 to vector<8x32xf32>
    %228 = arith.addf %227, %226 : vector<8x32xf32>
    %229 = arith.divf %227, %228 : vector<8x32xf32>
    %230 = vector.extract_strided_slice %223 {offsets = [0, 32], sizes = [8, 32], strides = [1, 1]} : vector<8x128xf32> to vector<8x32xf32>
    %231 = arith.negf %230 : vector<8x32xf32>
    %232 = math.exp %231 : vector<8x32xf32>
    %cst_69 = arith.constant 1.000000e+00 : f32
    %233 = vector.broadcast %cst_69 : f32 to vector<8x32xf32>
    %234 = arith.addf %233, %232 : vector<8x32xf32>
    %235 = arith.divf %233, %234 : vector<8x32xf32>
    %236 = vector.extract_strided_slice %223 {offsets = [0, 64], sizes = [8, 32], strides = [1, 1]} : vector<8x128xf32> to vector<8x32xf32>
    %237 = math.tanh %236 : vector<8x32xf32>
    %238 = vector.extract_strided_slice %223 {offsets = [0, 96], sizes = [8, 32], strides = [1, 1]} : vector<8x128xf32> to vector<8x32xf32>
    %239 = arith.negf %238 : vector<8x32xf32>
    %240 = math.exp %239 : vector<8x32xf32>
    %cst_70 = arith.constant 1.000000e+00 : f32
    %241 = vector.broadcast %cst_70 : f32 to vector<8x32xf32>
    %242 = arith.addf %241, %240 : vector<8x32xf32>
    %243 = arith.divf %241, %242 : vector<8x32xf32>
    %244 = arith.mulf %235, %212 : vector<8x32xf32>
    %245 = arith.mulf %229, %237 : vector<8x32xf32>
    %246 = arith.addf %244, %245 : vector<8x32xf32>
    %247 = math.tanh %246 : vector<8x32xf32>
    %248 = arith.mulf %243, %247 : vector<8x32xf32>
    %249 = arith.index_cast %c6_i32 : i32 to index
    %c0_71 = arith.constant 0 : index
    %c0_72 = arith.constant 0 : index
    %250 = vector.load %arg11[%249, %c0_71, %c0_72] : memref<8x8x32xf32, #tpu.memory_space<vmem>>, vector<1x8x32xf32>
    %251 = vector.shape_cast %250 : vector<1x8x32xf32> to vector<8x32xf32>
    %252 = vector.shape_cast %248 : vector<8x32xf32> to vector<1x8x32xf32>
    tpu.vector_store %arg11[%249, %c0_71, %c0_72], %252 {strides = array<i32>} : memref<8x8x32xf32, #tpu.memory_space<vmem>>, vector<1x8x32xf32>,
    %c7_i32 = arith.constant 7 : i32
    %253 = arith.index_cast %c7_i32 : i32 to index
    %c0_73 = arith.constant 0 : index
    %c0_74 = arith.constant 0 : index
    %254 = vector.load %arg10[%253, %c0_73, %c0_74] : memref<8x8x128xf32, #tpu.memory_space<vmem>>, vector<1x8x128xf32>
    %255 = vector.shape_cast %254 : vector<1x8x128xf32> to vector<8x128xf32>
    %cst_75 = arith.constant dense<0.000000e+00> : vector<8x128xf32>
    %256 = tpu.matmul %248, %12, %cst_75 {dimension_numbers = #tpu.dot_dimension_numbers<[1], [0], [0], [1], [0, 0, 1, 1], [], []>} : vector<8x32xf32>, vector<32x128xf32>, vector<8x128xf32> -> vector<8x128xf32>
    %257 = arith.addf %255, %256 : vector<8x128xf32>
    %258 = vector.extract_strided_slice %257 {offsets = [0, 0], sizes = [8, 32], strides = [1, 1]} : vector<8x128xf32> to vector<8x32xf32>
    %259 = arith.negf %258 : vector<8x32xf32>
    %260 = math.exp %259 : vector<8x32xf32>
    %cst_76 = arith.constant 1.000000e+00 : f32
    %261 = vector.broadcast %cst_76 : f32 to vector<8x32xf32>
    %262 = arith.addf %261, %260 : vector<8x32xf32>
    %263 = arith.divf %261, %262 : vector<8x32xf32>
    %264 = vector.extract_strided_slice %257 {offsets = [0, 32], sizes = [8, 32], strides = [1, 1]} : vector<8x128xf32> to vector<8x32xf32>
    %265 = arith.negf %264 : vector<8x32xf32>
    %266 = math.exp %265 : vector<8x32xf32>
    %cst_77 = arith.constant 1.000000e+00 : f32
    %267 = vector.broadcast %cst_77 : f32 to vector<8x32xf32>
    %268 = arith.addf %267, %266 : vector<8x32xf32>
    %269 = arith.divf %267, %268 : vector<8x32xf32>
    %270 = vector.extract_strided_slice %257 {offsets = [0, 64], sizes = [8, 32], strides = [1, 1]} : vector<8x128xf32> to vector<8x32xf32>
    %271 = math.tanh %270 : vector<8x32xf32>
    %272 = vector.extract_strided_slice %257 {offsets = [0, 96], sizes = [8, 32], strides = [1, 1]} : vector<8x128xf32> to vector<8x32xf32>
    %273 = arith.negf %272 : vector<8x32xf32>
    %274 = math.exp %273 : vector<8x32xf32>
    %cst_78 = arith.constant 1.000000e+00 : f32
    %275 = vector.broadcast %cst_78 : f32 to vector<8x32xf32>
    %276 = arith.addf %275, %274 : vector<8x32xf32>
    %277 = arith.divf %275, %276 : vector<8x32xf32>
    %278 = arith.mulf %269, %246 : vector<8x32xf32>
    %279 = arith.mulf %263, %271 : vector<8x32xf32>
    %280 = arith.addf %278, %279 : vector<8x32xf32>
    %281 = math.tanh %280 : vector<8x32xf32>
    %282 = arith.mulf %277, %281 : vector<8x32xf32>
    %283 = arith.index_cast %c7_i32 : i32 to index
    %c0_79 = arith.constant 0 : index
    %c0_80 = arith.constant 0 : index
    %284 = vector.load %arg11[%283, %c0_79, %c0_80] : memref<8x8x32xf32, #tpu.memory_space<vmem>>, vector<1x8x32xf32>
    %285 = vector.shape_cast %284 : vector<1x8x32xf32> to vector<8x32xf32>
    %286 = vector.shape_cast %282 : vector<8x32xf32> to vector<1x8x32xf32>
    tpu.vector_store %arg11[%283, %c0_79, %c0_80], %286 {strides = array<i32>} : memref<8x8x32xf32, #tpu.memory_space<vmem>>, vector<1x8x32xf32>,
    %c8_i32 = arith.constant 8 : i32
    %c0_81 = arith.constant 0 : index
    %c0_82 = arith.constant 0 : index
    %287 = vector.load %arg8[%c0_81, %c0_82] : memref<8x32xf32, #tpu.memory_space<vmem>>, vector<8x32xf32>
    tpu.vector_store %arg8[%c0_81, %c0_82], %282 {strides = array<i32>} : memref<8x32xf32, #tpu.memory_space<vmem>>, vector<8x32xf32>,
    %c0_83 = arith.constant 0 : index
    %c0_84 = arith.constant 0 : index
    %288 = vector.load %arg9[%c0_83, %c0_84] : memref<8x32xf32, #tpu.memory_space<vmem>>, vector<8x32xf32>
    tpu.vector_store %arg9[%c0_83, %c0_84], %280 {strides = array<i32>} : memref<8x32xf32, #tpu.memory_space<vmem>>, vector<8x32xf32>,
    %c0_85 = arith.constant 0 : index
    %c0_86 = arith.constant 0 : index
    %c0_87 = arith.constant 0 : index
    %289 = vector.load %arg11[%c0_85, %c0_86, %c0_87] : memref<8x8x32xf32, #tpu.memory_space<vmem>>, vector<8x8x32xf32>
    %290 = vector.shape_cast %289 : vector<8x8x32xf32> to vector<64x32xf32>
    %c0_88 = arith.constant 0 : index
    %c0_89 = arith.constant 0 : index
    %291 = vector.load %arg5[%c0_88, %c0_89] : memref<32x128xf32, #tpu.memory_space<vmem>>, vector<32x128xf32>
    %cst_90 = arith.constant dense<0.000000e+00> : vector<64x128xf32>
    %292 = tpu.matmul %290, %291, %cst_90 {dimension_numbers = #tpu.dot_dimension_numbers<[1], [0], [0], [1], [0, 0, 1, 1], [], []>} : vector<64x32xf32>, vector<32x128xf32>, vector<64x128xf32> -> vector<64x128xf32>
    %c0_91 = arith.constant 0 : index
    %c0_92 = arith.constant 0 : index
    %293 = vector.load %arg6[%c0_91, %c0_92] : memref<1x128xf32, #tpu.memory_space<vmem>>, vector<1x128xf32>
    %294 = vector.broadcast %293 : vector<1x128xf32> to vector<64x128xf32>
    %295 = arith.addf %292, %294 : vector<64x128xf32>
    %296 = tpu.iota {dimensions = array<i32: 1>} : vector<64x128xi32>
    %c8_i32_93 = arith.constant 8 : i32
    %297 = vector.broadcast %c8_i32_93 : i32 to vector<64x128xi32>
    %298 = arith.cmpi slt, %296, %297 : vector<64x128xi32>
    %cst_94 = arith.constant -3.40282347E+38 : f32
    %299 = vector.broadcast %cst_94 : f32 to vector<64x128xf32>
    %300 = arith.select %298, %295, %299 : vector<64x128xi1>, vector<64x128xf32>
    %cst_95 = arith.constant dense<0xFF800000> : vector<64xf32>
    %301 = vector.multi_reduction <maximumf>, %300, %cst_95 [1] : vector<64x128xf32> to vector<64xf32>
    %302 = vector.shape_cast %301 : vector<64xf32> to vector<64x1xf32>
    %303 = vector.broadcast %302 : vector<64x1xf32> to vector<64x128xf32>
    %304 = arith.subf %300, %303 : vector<64x128xf32>
    %305 = math.exp %304 : vector<64x128xf32>
    %cst_96 = arith.constant dense<0.000000e+00> : vector<64xf32>
    %306 = vector.multi_reduction <add>, %305, %cst_96 [1] : vector<64x128xf32> to vector<64xf32>
    %307 = vector.shape_cast %306 : vector<64xf32> to vector<64x1xf32>
    %308 = math.log %307 : vector<64x1xf32>
    %309 = vector.broadcast %308 : vector<64x1xf32> to vector<64x128xf32>
    %310 = arith.subf %304, %309 : vector<64x128xf32>
    %311 = vector.shape_cast %310 : vector<64x128xf32> to vector<8x8x128xf32>
    %312 = vector.extract_strided_slice %311 {offsets = [0, 0, 0], sizes = [8, 1, 128], strides = [1, 1, 1]} : vector<8x8x128xf32> to vector<8x1x128xf32>
    %313 = vector.shape_cast %312 : vector<8x1x128xf32> to vector<8x128xf32>
    %c0_97 = arith.constant 0 : index
    %c0_98 = arith.constant 0 : index
    %c0_99 = arith.constant 0 : index
    %314 = vector.load %arg7[%c0_97, %c0_98, %c0_99] : memref<8x8x128xf32, #tpu.memory_space<vmem>>, vector<1x8x128xf32>
    %315 = vector.shape_cast %314 : vector<1x8x128xf32> to vector<8x128xf32>
    %316 = vector.shape_cast %313 : vector<8x128xf32> to vector<1x8x128xf32>
    tpu.vector_store %arg7[%c0_97, %c0_98, %c0_99], %316 {strides = array<i32>} : memref<8x8x128xf32, #tpu.memory_space<vmem>>, vector<1x8x128xf32>,
    %317 = vector.extract_strided_slice %311 {offsets = [0, 1, 0], sizes = [8, 1, 128], strides = [1, 1, 1]} : vector<8x8x128xf32> to vector<8x1x128xf32>
    %318 = vector.shape_cast %317 : vector<8x1x128xf32> to vector<8x128xf32>
    %c1 = arith.constant 1 : index
    %c0_100 = arith.constant 0 : index
    %c0_101 = arith.constant 0 : index
    %319 = vector.load %arg7[%c1, %c0_100, %c0_101] : memref<8x8x128xf32, #tpu.memory_space<vmem>>, vector<1x8x128xf32>
    %320 = vector.shape_cast %319 : vector<1x8x128xf32> to vector<8x128xf32>
    %321 = vector.shape_cast %318 : vector<8x128xf32> to vector<1x8x128xf32>
    tpu.vector_store %arg7[%c1, %c0_100, %c0_101], %321 {strides = array<i32>} : memref<8x8x128xf32, #tpu.memory_space<vmem>>, vector<1x8x128xf32>,
    %322 = vector.extract_strided_slice %311 {offsets = [0, 2, 0], sizes = [8, 1, 128], strides = [1, 1, 1]} : vector<8x8x128xf32> to vector<8x1x128xf32>
    %323 = vector.shape_cast %322 : vector<8x1x128xf32> to vector<8x128xf32>
    %c2 = arith.constant 2 : index
    %c0_102 = arith.constant 0 : index
    %c0_103 = arith.constant 0 : index
    %324 = vector.load %arg7[%c2, %c0_102, %c0_103] : memref<8x8x128xf32, #tpu.memory_space<vmem>>, vector<1x8x128xf32>
    %325 = vector.shape_cast %324 : vector<1x8x128xf32> to vector<8x128xf32>
    %326 = vector.shape_cast %323 : vector<8x128xf32> to vector<1x8x128xf32>
    tpu.vector_store %arg7[%c2, %c0_102, %c0_103], %326 {strides = array<i32>} : memref<8x8x128xf32, #tpu.memory_space<vmem>>, vector<1x8x128xf32>,
    %327 = vector.extract_strided_slice %311 {offsets = [0, 3, 0], sizes = [8, 1, 128], strides = [1, 1, 1]} : vector<8x8x128xf32> to vector<8x1x128xf32>
    %328 = vector.shape_cast %327 : vector<8x1x128xf32> to vector<8x128xf32>
    %c3 = arith.constant 3 : index
    %c0_104 = arith.constant 0 : index
    %c0_105 = arith.constant 0 : index
    %329 = vector.load %arg7[%c3, %c0_104, %c0_105] : memref<8x8x128xf32, #tpu.memory_space<vmem>>, vector<1x8x128xf32>
    %330 = vector.shape_cast %329 : vector<1x8x128xf32> to vector<8x128xf32>
    %331 = vector.shape_cast %328 : vector<8x128xf32> to vector<1x8x128xf32>
    tpu.vector_store %arg7[%c3, %c0_104, %c0_105], %331 {strides = array<i32>} : memref<8x8x128xf32, #tpu.memory_space<vmem>>, vector<1x8x128xf32>,
    %332 = vector.extract_strided_slice %311 {offsets = [0, 4, 0], sizes = [8, 1, 128], strides = [1, 1, 1]} : vector<8x8x128xf32> to vector<8x1x128xf32>
    %333 = vector.shape_cast %332 : vector<8x1x128xf32> to vector<8x128xf32>
    %c4 = arith.constant 4 : index
    %c0_106 = arith.constant 0 : index
    %c0_107 = arith.constant 0 : index
    %334 = vector.load %arg7[%c4, %c0_106, %c0_107] : memref<8x8x128xf32, #tpu.memory_space<vmem>>, vector<1x8x128xf32>
    %335 = vector.shape_cast %334 : vector<1x8x128xf32> to vector<8x128xf32>
    %336 = vector.shape_cast %333 : vector<8x128xf32> to vector<1x8x128xf32>
    tpu.vector_store %arg7[%c4, %c0_106, %c0_107], %336 {strides = array<i32>} : memref<8x8x128xf32, #tpu.memory_space<vmem>>, vector<1x8x128xf32>,
    %337 = vector.extract_strided_slice %311 {offsets = [0, 5, 0], sizes = [8, 1, 128], strides = [1, 1, 1]} : vector<8x8x128xf32> to vector<8x1x128xf32>
    %338 = vector.shape_cast %337 : vector<8x1x128xf32> to vector<8x128xf32>
    %c5 = arith.constant 5 : index
    %c0_108 = arith.constant 0 : index
    %c0_109 = arith.constant 0 : index
    %339 = vector.load %arg7[%c5, %c0_108, %c0_109] : memref<8x8x128xf32, #tpu.memory_space<vmem>>, vector<1x8x128xf32>
    %340 = vector.shape_cast %339 : vector<1x8x128xf32> to vector<8x128xf32>
    %341 = vector.shape_cast %338 : vector<8x128xf32> to vector<1x8x128xf32>
    tpu.vector_store %arg7[%c5, %c0_108, %c0_109], %341 {strides = array<i32>} : memref<8x8x128xf32, #tpu.memory_space<vmem>>, vector<1x8x128xf32>,
    %342 = vector.extract_strided_slice %311 {offsets = [0, 6, 0], sizes = [8, 1, 128], strides = [1, 1, 1]} : vector<8x8x128xf32> to vector<8x1x128xf32>
    %343 = vector.shape_cast %342 : vector<8x1x128xf32> to vector<8x128xf32>
    %c6 = arith.constant 6 : index
    %c0_110 = arith.constant 0 : index
    %c0_111 = arith.constant 0 : index
    %344 = vector.load %arg7[%c6, %c0_110, %c0_111] : memref<8x8x128xf32, #tpu.memory_space<vmem>>, vector<1x8x128xf32>
    %345 = vector.shape_cast %344 : vector<1x8x128xf32> to vector<8x128xf32>
    %346 = vector.shape_cast %343 : vector<8x128xf32> to vector<1x8x128xf32>
    tpu.vector_store %arg7[%c6, %c0_110, %c0_111], %346 {strides = array<i32>} : memref<8x8x128xf32, #tpu.memory_space<vmem>>, vector<1x8x128xf32>,
    %347 = vector.extract_strided_slice %311 {offsets = [0, 7, 0], sizes = [8, 1, 128], strides = [1, 1, 1]} : vector<8x8x128xf32> to vector<8x1x128xf32>
    %348 = vector.shape_cast %347 : vector<8x1x128xf32> to vector<8x128xf32>
    %c7 = arith.constant 7 : index
    %c0_112 = arith.constant 0 : index
    %c0_113 = arith.constant 0 : index
    %349 = vector.load %arg7[%c7, %c0_112, %c0_113] : memref<8x8x128xf32, #tpu.memory_space<vmem>>, vector<1x8x128xf32>
    %350 = vector.shape_cast %349 : vector<1x8x128xf32> to vector<8x128xf32>
    %351 = vector.shape_cast %348 : vector<8x128xf32> to vector<1x8x128xf32>
    tpu.vector_store %arg7[%c7, %c0_112, %c0_113], %351 {strides = array<i32>} : memref<8x8x128xf32, #tpu.memory_space<vmem>>, vector<1x8x128xf32>,
    return
  }
  func.func @transform_0(%arg0: i32) -> (i32, i32, i32) {
    %c0_i32 = arith.constant 0 : i32
    %c0_i32_0 = arith.constant 0 : i32
    %c0_i32_1 = arith.constant 0 : i32
    return %arg0, %c0_i32, %c0_i32_0 : i32, i32, i32
  }
  func.func @transform_1(%arg0: i32) -> (i32, i32) {
    %c0_i32 = arith.constant 0 : i32
    %c0_i32_0 = arith.constant 0 : i32
    %c0_i32_1 = arith.constant 0 : i32
    return %c0_i32, %c0_i32_0 : i32, i32
  }
  func.func @transform_2(%arg0: i32) -> (i32, i32) {
    %c0_i32 = arith.constant 0 : i32
    %c0_i32_0 = arith.constant 0 : i32
    %c0_i32_1 = arith.constant 0 : i32
    return %c0_i32, %c0_i32_0 : i32, i32
  }
  func.func @transform_3(%arg0: i32) -> (i32, i32) {
    %c0_i32 = arith.constant 0 : i32
    %c0_i32_0 = arith.constant 0 : i32
    %c0_i32_1 = arith.constant 0 : i32
    return %c0_i32, %c0_i32_0 : i32, i32
  }
  func.func @transform_4(%arg0: i32) -> (i32, i32) {
    %c0_i32 = arith.constant 0 : i32
    %c0_i32_0 = arith.constant 0 : i32
    %c0_i32_1 = arith.constant 0 : i32
    return %c0_i32, %c0_i32_0 : i32, i32
  }
  func.func @transform_5(%arg0: i32) -> (i32, i32) {
    %c0_i32 = arith.constant 0 : i32
    %c0_i32_0 = arith.constant 0 : i32
    %c0_i32_1 = arith.constant 0 : i32
    return %c0_i32, %c0_i32_0 : i32, i32
  }
  func.func @transform_6(%arg0: i32) -> (i32, i32, i32) {
    %c0_i32 = arith.constant 0 : i32
    %c0_i32_0 = arith.constant 0 : i32
    %c0_i32_1 = arith.constant 0 : i32
    return %c0_i32, %arg0, %c0_i32_0 : i32, i32, i32
  }
}

</mosaic_0001>

<bundles_post_ra>
// kernel: tpu_custom_call.1
= control target key start
LH: loop header
LB: loop body
LE: loop exit
PB: predicated region body
PF: predicated region fallthrough
CT: control target
= control target key end

     0   :  { %11 = vsyncpa [#allocation7], 0  ;;  %s2362_s0 = inlined_call_operand.hbm [shape: f32[8,8,16], index: 0, kind: input, shape index: {}]   ;;  %s2363_s1 = inlined_call_operand.hbm [shape: f32[16,128], index: 1, kind: input, shape index: {}]   ;;  %s2364_s2 = inlined_call_operand.hbm [shape: f32[32,128], index: 2, kind: input, shape index: {}]   ;;  %s2365_s3 = inlined_call_operand.vmem [shape: f32[1,128], index: 3, kind: input, shape index: {}]   ;;  %s2366_s4 = inlined_call_operand.hbm [shape: f32[32,128], index: 4, kind: input, shape index: {}]   ;;  %s2367_s5 = inlined_call_operand.vmem [shape: f32[1,128], index: 5, kind: input, shape index: {}]   ;;  %s2368_s6 = inlined_call_operand.hbm [shape: f32[8,8,128], index: 6, kind: output, shape index: {}]  }
   0x1   :  { %12 = vsyncpa [#allocation10], 0 }
   0x2   :  { %13 = vsyncpa [#allocation13], 0 }
   0x3   :  { %14 = vsyncpa [#allocation8], 0  ;;  %s1972_s21 = smov [#allocation9]   ;;  %s1973_s23 = smov [#allocation6]  }
   0x4   :  { %s32_s22 = sshll.u32 %s1972_s21, 4  ;;  %s20_s24 = sshll.u32 %s1973_s23, 4  ;;  %s33_s22 = int_to_ptr.vmem [resolvable:$true] %s32_s22  ;;  %s2020_s24 = int_to_ptr.vmem [resolvable:$true] %s20_s24 }
   0x5   :  { %s1854_s27 = scalar_lea.hbm %s2363_s1, 256 }
   0x6   :  { %p1855_p0 = scmp.ne.s32.totalorder %s2363_s1, %s1854_s27  ;;  %p1858_p1 = scmp.lt.u32.totalorder %s1854_s27, %s2363_s1 }
   0x8   :  { %p1860_p2 = pnand %p1858_p1, %p1855_p0 }
   0xa   :  { %1863 = shalt.err (!%p1860_p2)
}
   0xb   :  { %s1864_s8 = scalar_lea.vmem %s33_s22, 256  ;;  %p1869_p4 = scmp.lt.s32.totalorder %s33_s22, %s33_s22 }
   0xc   :  { %p1865_p3 = scmp.ne.s32.totalorder %s33_s22, %s1864_s8  ;;  %p1870_p5 = scmp.lt.s32.totalorder %s1864_s8, %s1864_s8 }
   0xe   :  { %p1871_p6 = por %p1870_p5, %p1869_p4 }
  0x10   :  { %p1872_p7 = pnand %p1871_p6, %p1865_p3 }
  0x12   :  { %1875 = shalt.err (!%p1872_p7)
}
  0x13   :  { %s1974_s9 = smov 128   ;;  %s1975_s10 = smov 8  }
  0x14   :  { %38 = dma.hbm_to_vmem [thread:$0]  %s2363_s1, 256, %s33_s22, [#allocation10], %s1974_s9, %s1974_s9, %s1975_s10  }
  0x15   :  { %s1876_s15 = scalar_lea.hbm %s2362_s0, 1024 }
  0x16   :  { %p1877_p8 = scmp.ne.s32.totalorder %s2362_s0, %s1876_s15  ;;  %p1880_p9 = scmp.lt.u32.totalorder %s1876_s15, %s2362_s0 }
  0x18   :  { %p1882_p10 = pnand %p1880_p9, %p1877_p8 }
  0x1a   :  { %1885 = shalt.err (!%p1882_p10)
}
  0x1b   :  { %s1886_s20 = scalar_lea.vmem %s2020_s24, 1024  ;;  %p1891_p12 = scmp.lt.s32.totalorder %s2020_s24, %s2020_s24 }
  0x1c   :  { %p1887_p11 = scmp.ne.s32.totalorder %s2020_s24, %s1886_s20  ;;  %p1892_p13 = scmp.lt.s32.totalorder %s1886_s20, %s1886_s20 }
  0x1e   :  { %p1893_p0 = por %p1892_p13, %p1891_p12 }
  0x20   :  { %p1894_p1 = pnand %p1893_p0, %p1887_p11 }
  0x22   :  { %1897 = shalt.err (!%p1894_p1)
}
  0x23   :  { %26 = dma.hbm_to_vmem [thread:$0]  %s2362_s0, 1024, %s2020_s24, [#allocation7], %s1974_s9, %s1974_s9, %s1975_s10  }
  0x24   :  { %s1976_s22 = smov [#allocation11]   ;;  %s1977_s25 = smov [#allocation12]  }
  0x25   :  { %s44_s23 = sshll.u32 %s1976_s22, 4  ;;  %s58_s26 = sshll.u32 %s1977_s25, 4  ;;  %s45_s23 = int_to_ptr.vmem [resolvable:$true] %s44_s23  ;;  %s2057_s26 = int_to_ptr.vmem [resolvable:$true] %s58_s26 }
  0x26   :  { %s1898_s29 = scalar_lea.hbm %s2364_s2, 512 }
  0x27   :  { %p1899_p2 = scmp.ne.s32.totalorder %s2364_s2, %s1898_s29  ;;  %p1902_p3 = scmp.lt.u32.totalorder %s1898_s29, %s2364_s2 }
  0x29   :  { %p1904_p4 = pnand %p1902_p3, %p1899_p2 }
  0x2b   :  { %1907 = shalt.err (!%p1904_p4)
}
  0x2c   :  { %s1908_s0 = scalar_lea.vmem %s45_s23, 512  ;;  %p1913_p6 = scmp.lt.s32.totalorder %s45_s23, %s45_s23 }
  0x2d   :  { %p1909_p5 = scmp.ne.s32.totalorder %s45_s23, %s1908_s0  ;;  %p1914_p7 = scmp.lt.s32.totalorder %s1908_s0, %s1908_s0 }
  0x2f   :  { %p1915_p8 = por %p1914_p7, %p1913_p6 }
  0x31   :  { %p1916_p9 = pnand %p1915_p8, %p1909_p5 }
  0x33   :  { %1919 = shalt.err (!%p1916_p9)
}
  0x34   :  { %50 = dma.hbm_to_vmem [thread:$0]  %s2364_s2, 512, %s45_s23, [#allocation10], %s1974_s9, %s1974_s9, %s1975_s10  }
  0x35   :  { %s1920_s15 = scalar_lea.hbm %s2366_s4, 512 }
  0x36   :  { %p1921_p10 = scmp.ne.s32.totalorder %s2366_s4, %s1920_s15  ;;  %p1924_p11 = scmp.lt.u32.totalorder %s1920_s15, %s2366_s4 }
  0x38   :  { %p1926_p12 = pnand %p1924_p11, %p1921_p10 }
  0x3a   :  { %1929 = shalt.err (!%p1926_p12)
}
  0x3b   :  { %s1930_s20 = scalar_lea.vmem %s2057_s26, 512  ;;  %p1935_p0 = scmp.lt.s32.totalorder %s2057_s26, %s2057_s26 }
  0x3c   :  { %p1931_p13 = scmp.ne.s32.totalorder %s2057_s26, %s1930_s20  ;;  %p1936_p1 = scmp.lt.s32.totalorder %s1930_s20, %s1930_s20 }
  0x3e   :  { %p1937_p2 = por %p1936_p1, %p1935_p0 }
  0x40   :  { %p1938_p3 = pnand %p1937_p2, %p1931_p13 }
  0x42   :  { %1941 = shalt.err (!%p1938_p3)
}
  0x43   :  { %64 = dma.hbm_to_vmem [thread:$0]  %s2366_s4, 512, %s2057_s26, [#allocation13], %s1974_s9, %s1974_s9, %s1975_s10  }
  0x44   :  { %1964 = dma.done.wait [#allocation7], 1024  }
  0x45   :  { %1965 = vsyncadd [#allocation7], 4294966272 }
  0x46   :  { %1966 = dma.done.wait [#allocation10], 768  }
  0x47   :  { %1967 = vsyncadd [#allocation10], 4294966528 }
  0x48   :  { %1968 = dma.done.wait [#allocation13], 512  }
  0x49   :  { %1969 = vsyncadd [#allocation13], 4294966784  ;;  %vm83_vm0 = vcmask 261120   ;;  %v1978_v0 = vmov 0.0   ;;  %vm103_vm1 = vcmask 130048   ;;  %v94_v1 = vld [vmem:[#allocation9] sm:$0xff] }
  0x4a   :  { %84 = vst.msk [vmem:[#allocation2] sm:$0xff] %vm83_vm0, %v1978_v0  ;;  %85 = vst.msk [vmem:[#allocation3] sm:$0xff] %vm83_vm0, %v1978_v0  ;;  %v95_v2 = vld [vmem:[#allocation9 + $0x8] sm:$0xff]  ;;  %v90_v3 = vld [vmem:[#allocation6 + $0x20] sm:$0xff]  ;;  %v1979_v11 = vmov 0.0|0.0   ;;  %vm1980_vm2 = vmmov 0  }
  0x4b   :  { %v1683_v4 = vpack.c.bf16 %v95_v2, %v94_v1  ;;  %1569 = vmatprep.mubr.msk.f32.mxu1 %vm103_vm1, %v90_v3  ;;  %v241_v5 = vld [vmem:[#allocation11] sm:$0xff]  ;;  %v242_v6 = vld [vmem:[#allocation11 + $0x8] sm:$0xff]  ;;  %v86_v7 = vld [vmem:[#allocation6] sm:$0xff]  ;;  %s1981_s22 = smov 64   ;;  %s1982_s23 = smov 32   ;;  %vm1345_vm4 = vcmask 1041409  }
  0x4c   :  { %v91_v8 = vld [vmem:[#allocation6 + $0x28] sm:$0xff]  ;;  %v2099_v9 = vpack.c.bf16 %v242_v6, %v241_v5  ;;  %v92_v12 = vld [vmem:[#allocation6 + $0x30] sm:$0xff]  ;;  %1563 = vmatprep.mubr.msk.f32.mxu0 %vm103_vm1, %v86_v7  ;;  %v243_v13 = vld [vmem:[#allocation11 + $0x10] sm:$0xff]  ;;  %vm1348_vm5 = vcmask 1042434   ;;  %vm1351_vm6 = vcmask 1043459   ;;  %vm1354_vm7 = vcmask 1044484  }
  0x4d   :  { %1743 = vmatprep.subr.bf16.mxu1 %v1683_v4  ;;  %1684 = vmatprep.subr.bf16.mxu0 %v1683_v4  ;;  %v87_v10 = vld [vmem:[#allocation6 + $0x8] sm:$0xff]  ;;  %v93_v15 = vld [vmem:[#allocation6 + $0x38] sm:$0xff]  ;;  %v2134_v22 = vld [vmem:[%s2365_s3] ss:$0 sm:$0xff]  ;;  %vm1357_vm8 = vcmask 1045509   ;;  %vm1360_vm9 = vcmask 1046534  }
  0x4e   :  { %1744 = vmatpush3.bf16.msra.mxu1 %v1683_v4  ;;  %1686 = vmatpush3.bf16.msra.mxu0 %v1683_v4  ;;  %v244_v14 = vld [vmem:[#allocation11 + $0x18] sm:$0xff]  ;;  %v88_v59 = vld [vmem:[#allocation6 + $0x10] sm:$0xff]  ;;  %v89_v60 = vld [vmem:[#allocation6 + $0x18] sm:$0xff]  ;;  %vm1363_vm10 = vcmask 1047559   ;;  %s1984_s26 = smov [#allocation14]  }
  0x4f   :  { %1687 = vmatprep.subr.bf16.mxu1 %v1979_v11  ;;  %1699 = vmatprep.subr.bf16.mxu0 %v1979_v11  ;;  %v2108_v16 = vpack.c.bf16 %v244_v14, %v243_v13  ;;  %s1449_s27 = sshll.u32 %s1984_s26, 4  ;;  %s1450_s27 = int_to_ptr.vmem [resolvable:$true] %s1449_s27 }
  0x50   :  { %s1942_s28 = scalar_lea.vmem %s1450_s27, 1024  ;;  %p1947_p5 = scmp.lt.s32.totalorder %s1450_s27, %s1450_s27 }
  0x51   :  { %1570 = vmatmul.mubr.msk.f32.vlgmr.msra.gmra.mrb[0].mxu1 %vm103_vm1, %v91_v8  ;;  %1564 = vmatmul.mubr.msk.f32.vlgmr.msra.gmra.mrb[0].mxu0 %vm103_vm1, %v87_v10  ;;  %v245_v17 = vld [vmem:[#allocation2] sm:$0xff]  ;;  %v246_v30 = vld [vmem:[#allocation3] sm:$0xff]  ;;  %p1943_p4 = scmp.ne.s32.totalorder %s1450_s27, %s1942_s28  ;;  %p1948_p6 = scmp.lt.s32.totalorder %s1942_s28, %s1942_s28 }
  0x52   :  { %1689 = vmatpush3.bf16.msra.mxu1 %v2099_v9  ;;  %1572 = vmatprep.mubr.msk.f32.mxu1 %vm103_vm1, %v92_v12 }
  0x53   :  { %1690 = vmatprep.subr.bf16.mxu1 %v1979_v11  ;;  %1701 = vmatpush3.bf16.msra.mxu0 %v2099_v9  ;;  %p1949_p7 = por %p1948_p6, %p1947_p5 }
  0x54   :  { %1702 = vmatprep.subr.bf16.mxu0 %v1979_v11  ;;  %1566 = vmatprep.mubr.msk.f32.mxu0 %vm103_vm1, %v88_v59 }
  0x55   :  { %1573 = vmatmul.mubr.msk.f32.gmra.mrb[2].mxu1 %vm103_vm1, %v93_v15  ;;  %1567 = vmatmul.mubr.msk.f32.gmra.mrb[2].mxu0 %vm103_vm1, %v89_v60  ;;  %p1950_p8 = pnand %p1949_p7, %p1943_p4 }
  0x56   :  { %1692 = vmatpush3.bf16.msra.mxu1 %v2108_v16  ;;  %1583 = vmatprep.mubr.msk.f32.mxu1 %vm1980_vm2, %v1978_v0 }
  0x57   :  { %1693 = vmatprep.subr.bf16.mxu1 %v1979_v11  ;;  %1704 = vmatpush3.bf16.msra.mxu0 %v2108_v16 }
  0x58   :  { %1711 = vmatprep.subr.bf16.mxu0 %v1979_v11  ;;  %1605 = vmatprep.mubr.msk.f32.mxu0 %vm1980_vm2, %v1978_v0 }
  0x59   :  { %1584 = vmatmul.mubr.msk.f32.vlgmr.msra.gmra.mrb[4].mxu1 %vm83_vm0, %v245_v17 }
  0x5a   :  { %1695 = vmatpush3.bf16.msra.mxu1 %v2099_v9  ;;  %1594 = vmatprep.mubr.msk.f32.mxu1 %vm1980_vm2, %v1978_v0 }
  0x5b   :  { %1696 = vmatprep.subr.bf16.mxu1 %v1979_v11 }
  0x5e   :  { %1698 = vmatpush3.bf16.msra.mxu1 %v2108_v16 }
  0x5f   :  { %1705 = vmatprep.subr.bf16.mxu1 %v1979_v11 }
 0x124   :  { %v2127_v18 = vpop.f32.mrb[0].mxu1  ;;  %v1565_v19 = vpop.f32.mrb[0].mxu0 }
 0x125   :  { %v2129_v20 = vpop.f32.mrb[1].mxu1  ;;  %v194_v21 = vpop.f32.mrb[1].mxu0  ;;  %v200_v45 = vadd.f32 %v1565_v19, %v2134_v22 }
 0x126   :  { %v195_v25 = vadd.f32 %v2134_v22, %v194_v21 }
 0x128   :  { %v2136_v23 = vpop.f32.mrb[2].mxu1  ;;  %v1568_v1 = vpop.f32.mrb[2].mxu0 }
 0x129   :  { %v2138_v24 = vpop.f32.mrb[3].mxu1  ;;  %v204_v2 = vpop.f32.mrb[3].mxu0 }
 0x12a   :  { %v205_v4 = vadd.f32 %v2134_v22, %v204_v2  ;;  %v220_v2 = vadd.f32 %v2127_v18, %v2134_v22 }
 0x12c   :  { %v318_v26 = vpop.f32.mrb[4].mxu1 }
 0x12d   :  { %v322_v27 = vadd.f32 %v318_v26, %v195_v25  ;;  %v1585_v28 = vpop.f32.mrb[5].mxu1 }
 0x12f   :  { %1758 = vtanh.f32 %v322_v27  ;;  %v1473_v31 = vmul.f32 -1.442695, %v322_v27 }
 0x131   :  { %1760 = vpow2.f32 %v1473_v31 }
 0x139   :  { %v1759_v29 = vpop.eup %1758 }
 0x13a   :  { %336 = vrot.lane.b32.xlu0 %v1759_v29, %s1981_s22 }
 0x13b   :  { %v1761_v32 = vpop.eup %1760 }
 0x13c   :  { %v326_v33 = vadd.f32 1.0, %v1761_v32 }
 0x13e   :  { %331 = vrot.lane.b32.xlu0 %v246_v30, %s1982_s23  ;;  %1762 = vrcp.f32 %v326_v33  ;;  %v210_v30 = vadd.f32 %v1568_v1, %v2134_v22 }
 0x148   :  { %v1763_v34 = vpop.eup %1762 }
 0x1ac   :  { %v337_v35 = vpop.permute.xlu0 %336 }
 0x1ad   :  { %v339_v36 = vmul.f32 %v1763_v34, %v337_v35 }
 0x1af   :  { %341 = vrot.lane.b32.xlu1 %v339_v36, %s1982_s23 }
 0x1b0   :  { %v332_v37 = vpop.permute.xlu0 %331 }
 0x1b1   :  { %v334_v38 = vmul.f32 %v1763_v34, %v332_v37 }
 0x221   :  { %v342_v39 = vpop.permute.xlu1 %341 }
 0x222   :  { %v344_v40 = vadd.f32 %v342_v39, %v334_v38 }
 0x224   :  { %1764 = vtanh.f32 %v344_v40 }
 0x22e   :  { %v1765_v41 = vpop.eup %1764 }
 0x22f   :  { %347 = vrot.lane.b32.xlu1 %v1765_v41, %s1981_s22 }
 0x2a1   :  { %v348_v42 = vpop.permute.xlu1 %347 }
 0x2a2   :  { %v350_v43 = vmul.f32 %v1763_v34, %v348_v42 }
 0x2a4   :  { %352 = vrot.lane.b32.xlu0 %v350_v43, %s1982_s23 }
 0x316   :  { %v353_v44 = vpop.permute.xlu0 %352 }
 0x317   :  { %355 = vst.msk [vmem:[#allocation5] sm:$0xff] %vm83_vm0, %v353_v44  ;;  %1595 = vmatmul.mubr.msk.f32.vlgmr.msra.gmra.mrb[6].mxu1 %vm83_vm0, %v353_v44 }
 0x318   :  { %1707 = vmatpush3.bf16.msra.mxu1 %v2099_v9  ;;  %1616 = vmatprep.mubr.msk.f32.mxu1 %vm1980_vm2, %v1978_v0 }
 0x319   :  { %1708 = vmatprep.subr.bf16.mxu1 %v1979_v11 }
 0x31c   :  { %1710 = vmatpush3.bf16.msra.mxu1 %v2108_v16 }
 0x31d   :  { %1717 = vmatprep.subr.bf16.mxu1 %v1979_v11 }
 0x3ea   :  { %v426_v46 = vpop.f32.mrb[6].mxu1 }
 0x3eb   :  { %v430_v47 = vadd.f32 %v426_v46, %v200_v45  ;;  %v1596_v48 = vpop.f32.mrb[7].mxu1 }
 0x3ec   :  { %v215_v48 = vadd.f32 %v2134_v22, %v2129_v20 }
 0x3ed   :  { %1766 = vtanh.f32 %v430_v47  ;;  %v1475_v50 = vmul.f32 -1.442695, %v430_v47 }
 0x3ef   :  { %1768 = vpow2.f32 %v1475_v50 }
 0x3f7   :  { %v1767_v49 = vpop.eup %1766 }
 0x3f8   :  { %440 = vrot.lane.b32.xlu1 %v1767_v49, %s1981_s22 }
 0x3f9   :  { %v1769_v51 = vpop.eup %1768 }
 0x3fa   :  { %v434_v52 = vadd.f32 1.0, %v1769_v51 }
 0x3fc   :  { %1770 = vrcp.f32 %v434_v52 }
 0x406   :  { %v1771_v53 = vpop.eup %1770 }
 0x407   :  { %v438_v56 = vmul.f32 %v1771_v53, %v344_v40 }
 0x46a   :  { %v441_v54 = vpop.permute.xlu1 %440 }
 0x46b   :  { %v443_v55 = vmul.f32 %v1771_v53, %v441_v54 }
 0x46d   :  { %445 = vrot.lane.b32.xlu0 %v443_v55, %s1982_s23 }
 0x4df   :  { %v446_v57 = vpop.permute.xlu0 %445 }
 0x4e0   :  { %v448_v58 = vadd.f32 %v446_v57, %v438_v56 }
 0x4e2   :  { %1772 = vtanh.f32 %v448_v58 }
 0x4ec   :  { %v1773_v61 = vpop.eup %1772 }
 0x4ed   :  { %451 = vrot.lane.b32.xlu1 %v1773_v61, %s1981_s22 }
 0x55f   :  { %v452_v62 = vpop.permute.xlu1 %451 }
 0x560   :  { %v454_v63 = vmul.f32 %v1771_v53, %v452_v62 }
 0x562   :  { %456 = vrot.lane.b32.xlu0 %v454_v63, %s1982_s23 }
 0x5d4   :  { %v457_v3 = vpop.permute.xlu0 %456 }
 0x5d5   :  { %460 = vst.msk [vmem:[#allocation5 + $0x8] sm:$0xff] %vm83_vm0, %v457_v3  ;;  %1606 = vmatmul.mubr.msk.f32.vlgmr.msra.gmra.mrb[4].mxu0 %vm83_vm0, %v457_v3 }
 0x5d6   :  { %1713 = vmatpush3.bf16.msra.mxu0 %v2099_v9  ;;  %1627 = vmatprep.mubr.msk.f32.mxu0 %vm1980_vm2, %v1978_v0 }
 0x5d7   :  { %1714 = vmatprep.subr.bf16.mxu0 %v1979_v11 }
 0x5da   :  { %1716 = vmatpush3.bf16.msra.mxu0 %v2108_v16 }
 0x5db   :  { %1723 = vmatprep.subr.bf16.mxu0 %v1979_v11 }
 0x6a8   :  { %v531_v5 = vpop.f32.mrb[4].mxu0 }
 0x6a9   :  { %v535_v6 = vadd.f32 %v531_v5, %v205_v4  ;;  %v1607_v7 = vpop.f32.mrb[5].mxu0 }
 0x6ab   :  { %1774 = vtanh.f32 %v535_v6  ;;  %v1477_v10 = vmul.f32 -1.442695, %v535_v6 }
 0x6ad   :  { %1776 = vpow2.f32 %v1477_v10 }
 0x6b5   :  { %v1775_v8 = vpop.eup %1774 }
 0x6b6   :  { %545 = vrot.lane.b32.xlu1 %v1775_v8, %s1981_s22 }
 0x6b7   :  { %v1777_v12 = vpop.eup %1776 }
 0x6b8   :  { %v539_v13 = vadd.f32 1.0, %v1777_v12 }
 0x6ba   :  { %1778 = vrcp.f32 %v539_v13  ;;  %v1105_v13 = vld [vmem:[#allocation12] sm:$0xff] }
 0x6c4   :  { %v1779_v14 = vpop.eup %1778 }
 0x6c5   :  { %v543_v19 = vmul.f32 %v1779_v14, %v448_v58 }
 0x728   :  { %v546_v15 = vpop.permute.xlu1 %545 }
 0x729   :  { %v548_v17 = vmul.f32 %v1779_v14, %v546_v15 }
 0x72b   :  { %550 = vrot.lane.b32.xlu0 %v548_v17, %s1982_s23 }
 0x79d   :  { %v551_v21 = vpop.permute.xlu0 %550 }
 0x79e   :  { %v553_v25 = vadd.f32 %v551_v21, %v543_v19 }
 0x7a0   :  { %1780 = vtanh.f32 %v553_v25 }
 0x7aa   :  { %v1781_v26 = vpop.eup %1780 }
 0x7ab   :  { %556 = vrot.lane.b32.xlu1 %v1781_v26, %s1981_s22  ;;  %v1108_v26 = vld [vmem:[#allocation12 + $0x18] sm:$0xff] }
 0x81d   :  { %v557_v27 = vpop.permute.xlu1 %556 }
 0x81e   :  { %v559_v28 = vmul.f32 %v1779_v14, %v557_v27  ;;  %v1106_v14 = vld [vmem:[#allocation12 + $0x8] sm:$0xff] }
 0x81f   :  { %v1735_v15 = vpack.c.bf16 %v1106_v14, %v1105_v13 }
 0x820   :  { %561 = vrot.lane.b32.xlu0 %v559_v28, %s1982_s23 }
 0x892   :  { %v562_v29 = vpop.permute.xlu0 %561 }
 0x893   :  { %565 = vst.msk [vmem:[#allocation5 + $0x10] sm:$0xff] %vm83_vm0, %v562_v29  ;;  %1617 = vmatmul.mubr.msk.f32.vlgmr.msra.gmra.mrb[8].mxu1 %vm83_vm0, %v562_v29  ;;  %v1097_v29 = vld [vmem:[#allocation5] sm:$0xff] }
 0x894   :  { %1719 = vmatpush3.bf16.msra.mxu1 %v2099_v9  ;;  %1638 = vmatprep.mubr.msk.f32.mxu1 %vm1980_vm2, %v1978_v0 }
 0x895   :  { %1720 = vmatprep.subr.bf16.mxu1 %v1979_v11 }
 0x898   :  { %1722 = vmatpush3.bf16.msra.mxu1 %v2108_v16 }
 0x899   :  { %1729 = vmatprep.subr.bf16.mxu1 %v1979_v11 }
 0x966   :  { %v636_v31 = vpop.f32.mrb[8].mxu1 }
 0x967   :  { %v640_v32 = vadd.f32 %v636_v31, %v210_v30  ;;  %v1618_v33 = vpop.f32.mrb[9].mxu1  ;;  %v1098_v30 = vld [vmem:[#allocation5 + $0x8] sm:$0xff]  ;;  %v1099_v31 = vld [vmem:[#allocation5 + $0x10] sm:$0xff] }
 0x969   :  { %1782 = vtanh.f32 %v640_v32  ;;  %v1479_v35 = vmul.f32 -1.442695, %v640_v32 }
 0x96b   :  { %1784 = vpow2.f32 %v1479_v35  ;;  %v225_v35 = vadd.f32 %v2134_v22, %v2138_v24 }
 0x973   :  { %v1783_v34 = vpop.eup %1782 }
 0x974   :  { %650 = vrot.lane.b32.xlu1 %v1783_v34, %s1981_s22 }
 0x975   :  { %v1785_v36 = vpop.eup %1784 }
 0x976   :  { %v644_v37 = vadd.f32 1.0, %v1785_v36 }
 0x978   :  { %1786 = vrcp.f32 %v644_v37 }
 0x982   :  { %v1787_v38 = vpop.eup %1786 }
 0x983   :  { %v648_v41 = vmul.f32 %v1787_v38, %v553_v25  ;;  %v1107_v25 = vld [vmem:[#allocation12 + $0x10] sm:$0xff] }
 0x984   :  { %v1739_v27 = vpack.c.bf16 %v1108_v26, %v1107_v25 }
 0x9e6   :  { %v651_v39 = vpop.permute.xlu1 %650 }
 0x9e7   :  { %v653_v40 = vmul.f32 %v1787_v38, %v651_v39 }
 0x9e9   :  { %655 = vrot.lane.b32.xlu0 %v653_v40, %s1982_s23 }
 0xa5b   :  { %v656_v42 = vpop.permute.xlu0 %655 }
 0xa5c   :  { %v658_v43 = vadd.f32 %v656_v42, %v648_v41 }
 0xa5e   :  { %1788 = vtanh.f32 %v658_v43 }
 0xa68   :  { %v1789_v44 = vpop.eup %1788 }
 0xa69   :  { %661 = vrot.lane.b32.xlu1 %v1789_v44, %s1981_s22 }
 0xadb   :  { %v662_v45 = vpop.permute.xlu1 %661 }
 0xadc   :  { %v664_v46 = vmul.f32 %v1787_v38, %v662_v45 }
 0xade   :  { %666 = vrot.lane.b32.xlu0 %v664_v46, %s1982_s23 }
 0xb50   :  { %v667_v47 = vpop.permute.xlu0 %666 }
 0xb51   :  { %670 = vst.msk [vmem:[#allocation5 + $0x18] sm:$0xff] %vm83_vm0, %v667_v47  ;;  %1628 = vmatmul.mubr.msk.f32.vlgmr.msra.gmra.mrb[6].mxu0 %vm83_vm0, %v667_v47 }
 0xb52   :  { %1725 = vmatpush3.bf16.msra.mxu0 %v2099_v9  ;;  %1649 = vmatprep.mubr.msk.f32.mxu0 %vm1980_vm2, %v1978_v0 }
 0xb53   :  { %1726 = vmatprep.subr.bf16.mxu0 %v1979_v11 }
 0xb56   :  { %1728 = vmatpush3.bf16.msra.mxu0 %v2108_v16 }
 0xb57   :  { %1736 = vmatprep.subr.bf16.mxu0 %v1735_v15 }
 0xb58   :  { %v1100_v32 = vld [vmem:[#allocation5 + $0x18] sm:$0xff] }
 0xc24   :  { %v741_v49 = vpop.f32.mrb[6].mxu0 }
 0xc25   :  { %v745_v50 = vadd.f32 %v741_v49, %v215_v48  ;;  %v1629_v51 = vpop.f32.mrb[7].mxu0 }
 0xc27   :  { %1790 = vtanh.f32 %v745_v50  ;;  %v1481_v53 = vmul.f32 -1.442695, %v745_v50 }
 0xc29   :  { %1792 = vpow2.f32 %v1481_v53 }
 0xc31   :  { %v1791_v52 = vpop.eup %1790 }
 0xc32   :  { %755 = vrot.lane.b32.xlu1 %v1791_v52, %s1981_s22 }
 0xc33   :  { %v1793_v54 = vpop.eup %1792 }
 0xc34   :  { %v749_v55 = vadd.f32 1.0, %v1793_v54 }
 0xc36   :  { %1794 = vrcp.f32 %v749_v55 }
 0xc40   :  { %v1795_v56 = vpop.eup %1794 }
 0xc41   :  { %v753_v59 = vmul.f32 %v1795_v56, %v658_v43 }
 0xca4   :  { %v756_v57 = vpop.permute.xlu1 %755 }
 0xca5   :  { %v758_v58 = vmul.f32 %v1795_v56, %v756_v57 }
 0xca7   :  { %760 = vrot.lane.b32.xlu0 %v758_v58, %s1982_s23 }
 0xd19   :  { %v761_v60 = vpop.permute.xlu0 %760 }
 0xd1a   :  { %v763_v20 = vadd.f32 %v761_v60, %v753_v59  ;;  %v230_v59 = vadd.f32 %v2136_v23, %v2134_v22 }
 0xd1c   :  { %1796 = vtanh.f32 %v763_v20 }
 0xd26   :  { %v1797_v61 = vpop.eup %1796 }
 0xd27   :  { %766 = vrot.lane.b32.xlu1 %v1797_v61, %s1981_s22 }
 0xd99   :  { %v767_v62 = vpop.permute.xlu1 %766 }
 0xd9a   :  { %v769_v63 = vmul.f32 %v1795_v56, %v767_v62 }
 0xd9c   :  { %771 = vrot.lane.b32.xlu0 %v769_v63, %s1982_s23 }
 0xe0e   :  { %v772_v1 = vpop.permute.xlu0 %771 }
 0xe0f   :  { %775 = vst.msk [vmem:[#allocation5 + $0x20] sm:$0xff] %vm83_vm0, %v772_v1  ;;  %1639 = vmatmul.mubr.msk.f32.vlgmr.msra.gmra.mrb[10].mxu1 %vm83_vm0, %v772_v1 }
 0xe10   :  { %1731 = vmatpush3.bf16.msra.mxu1 %v2099_v9  ;;  %1660 = vmatprep.mubr.msk.f32.mxu1 %vm1980_vm2, %v1978_v0 }
 0xe11   :  { %1732 = vmatprep.subr.bf16.mxu1 %v1979_v11 }
 0xe14   :  { %1734 = vmatpush3.bf16.msra.mxu1 %v2108_v16 }
 0xe16   :  { %v1101_v33 = vld [vmem:[#allocation5 + $0x20] sm:$0xff] }
 0xee2   :  { %v846_v3 = vpop.f32.mrb[10].mxu1 }
 0xee3   :  { %v850_v4 = vadd.f32 %v846_v3, %v220_v2  ;;  %v1640_v5 = vpop.f32.mrb[11].mxu1 }
 0xee5   :  { %1798 = vtanh.f32 %v850_v4  ;;  %v1483_v7 = vmul.f32 -1.442695, %v850_v4 }
 0xee7   :  { %1800 = vpow2.f32 %v1483_v7 }
 0xeef   :  { %v1799_v6 = vpop.eup %1798 }
 0xef0   :  { %860 = vrot.lane.b32.xlu1 %v1799_v6, %s1981_s22 }
 0xef1   :  { %v1801_v9 = vpop.eup %1800 }
 0xef2   :  { %v854_v8 = vadd.f32 1.0, %v1801_v9  ;;  %v1245_v9 = vlaneseq }
 0xef4   :  { %1802 = vrcp.f32 %v854_v8  ;;  %v1488_v8 = vld [vmem:[%s2367_s5] ss:$0 sm:$0xff]  ;;  %s1983_s5 = smov 96  }
 0xefe   :  { %v1803_v0 = vpop.eup %1802 }
 0xeff   :  { %v858_v16 = vmul.f32 %v1803_v0, %v763_v20 }
 0xf62   :  { %v861_v10 = vpop.permute.xlu1 %860 }
 0xf63   :  { %v863_v11 = vmul.f32 %v1803_v0, %v861_v10 }
 0xf65   :  { %865 = vrot.lane.b32.xlu0 %v863_v11, %s1982_s23 }
 0xfd7   :  { %v866_v12 = vpop.permute.xlu0 %865 }
 0xfd8   :  { %v868_v18 = vadd.f32 %v866_v12, %v858_v16 }
 0xfda   :  { %1804 = vtanh.f32 %v868_v18 }
 0xfe4   :  { %v1805_v17 = vpop.eup %1804 }
 0xfe5   :  { %871 = vrot.lane.b32.xlu1 %v1805_v17, %s1981_s22 }
0x1057   :  { %v872_v19 = vpop.permute.xlu1 %871 }
0x1058   :  { %v874_v21 = vmul.f32 %v1803_v0, %v872_v19  ;;  %v1246_v0 = vand.u32 127, %v1245_v9 }
0x105a   :  { %876 = vrot.lane.b32.xlu0 %v874_v21, %s1982_s23  ;;  %vm1247_vm3 = vcmp.lt.s32.totalorder %v1246_v0, 8 }
0x10cc   :  { %v877_v28 = vpop.permute.xlu0 %876 }
0x10cd   :  { %880 = vst.msk [vmem:[#allocation5 + $0x28] sm:$0xff] %vm83_vm0, %v877_v28  ;;  %1650 = vmatmul.mubr.msk.f32.vlgmr.msra.gmra.mrb[8].mxu0 %vm83_vm0, %v877_v28 }
0x10ce   :  { %1738 = vmatpush3.bf16.msra.mxu0 %v1735_v15  ;;  %1671 = vmatprep.mubr.msk.f32.mxu0 %vm83_vm0, %v1097_v29 }
0x10cf   :  { %1740 = vmatprep.subr.bf16.mxu0 %v1739_v27 }
0x10d2   :  { %1742 = vmatpush3.bf16.msra.mxu0 %v1739_v27 }
0x10d4   :  { %v1102_v34 = vld [vmem:[#allocation5 + $0x28] sm:$0xff] }
0x10d5   :  { %1672 = vmatmul.mubr.msk.f32.vlgmr.msra.gmra.mrb[10].mxu0 %vm83_vm0, %v1098_v30 }
0x10d6   :  { %1674 = vmatprep.mubr.msk.f32.mxu0 %vm83_vm0, %v1099_v31 }
0x10d9   :  { %1675 = vmatmul.mubr.msk.f32.gmra.mrb[12].mxu0 %vm83_vm0, %v1100_v32 }
0x10da   :  { %1677 = vmatprep.mubr.msk.f32.mxu0 %vm83_vm0, %v1101_v33 }
0x10dd   :  { %1678 = vmatmul.mubr.msk.f32.gmra.mrb[14].mxu0 %vm83_vm0, %v1102_v34 }
0x11a0   :  { %v951_v36 = vpop.f32.mrb[8].mxu0 }
0x11a1   :  { %v955_v37 = vadd.f32 %v951_v36, %v225_v35  ;;  %v1651_v38 = vpop.f32.mrb[9].mxu0 }
0x11a3   :  { %1806 = vtanh.f32 %v955_v37  ;;  %v1485_v46 = vmul.f32 -1.442695, %v955_v37 }
0x11a5   :  { %1808 = vpow2.f32 %v1485_v46 }
0x11a8   :  { %v1673_v39 = vpop.f32.mrb[10].mxu0 }
0x11a9   :  { %v2225_v40 = vpop.f32.mrb[11].mxu0  ;;  %v1212_v10 = vadd.f32 %v1673_v39, %v1488_v8 }
0x11aa   :  { %v1207_v19 = vadd.f32 %v1488_v8, %v2225_v40 }
0x11ab   :  { %v1249_v16 = vsel %vm1247_vm3, %v1212_v10, -3.4028235e+38 }
0x11ac   :  { %v1676_v41 = vpop.f32.mrb[12].mxu0  ;;  %v1248_v26 = vsel %vm1247_vm3, %v1207_v19, -3.4028235e+38 }
0x11ad   :  { %v1807_v42 = vpop.eup %1806  ;;  %v2227_v43 = vpop.f32.mrb[13].mxu0  ;;  %v1222_v11 = vadd.f32 %v1676_v41, %v1488_v8 }
0x11ae   :  { %965 = vrot.lane.b32.xlu1 %v1807_v42, %s1981_s22  ;;  %v1217_v17 = vadd.f32 %v1488_v8, %v2227_v43 }
0x11af   :  { %v1809_v47 = vpop.eup %1808 }
0x11b0   :  { %v1679_v44 = vpop.f32.mrb[14].mxu0  ;;  %v959_v24 = vadd.f32 1.0, %v1809_v47  ;;  %v1250_v21 = vsel %vm1247_vm3, %v1217_v17, -3.4028235e+38 }
0x11b1   :  { %v2230_v45 = vpop.f32.mrb[15].mxu0  ;;  %v1232_v12 = vadd.f32 %v1679_v44, %v1488_v8 }
0x11b2   :  { %1810 = vrcp.f32 %v959_v24  ;;  %v1227_v25 = vadd.f32 %v1488_v8, %v2230_v45 }
0x11b3   :  { %v1253_v13 = vsel %vm1247_vm3, %v1232_v12, -3.4028235e+38 }
0x11b4   :  { %v1252_v27 = vsel %vm1247_vm3, %v1227_v25, -3.4028235e+38 }
0x11bc   :  { %v1811_v48 = vpop.eup %1810 }
0x11bd   :  { %v963_v51 = vmul.f32 %v1811_v48, %v868_v18  ;;  %v1251_v18 = vsel %vm1247_vm3, %v1222_v11, -3.4028235e+38 }
0x1220   :  { %v966_v49 = vpop.permute.xlu1 %965 }
0x1221   :  { %v968_v50 = vmul.f32 %v1811_v48, %v966_v49 }
0x1223   :  { %970 = vrot.lane.b32.xlu0 %v968_v50, %s1982_s23 }
0x1295   :  { %v971_v52 = vpop.permute.xlu0 %970 }
0x1296   :  { %v973_v53 = vadd.f32 %v971_v52, %v963_v51 }
0x1298   :  { %1812 = vtanh.f32 %v973_v53 }
0x12a2   :  { %v1813_v54 = vpop.eup %1812 }
0x12a3   :  { %976 = vrot.lane.b32.xlu1 %v1813_v54, %s1981_s22 }
0x1315   :  { %v977_v55 = vpop.permute.xlu1 %976 }
0x1316   :  { %v979_v56 = vmul.f32 %v1811_v48, %v977_v55 }
0x1318   :  { %981 = vrot.lane.b32.xlu0 %v979_v56, %s1982_s23 }
0x138a   :  { %v982_v57 = vpop.permute.xlu0 %981 }
0x138b   :  { %985 = vst.msk [vmem:[#allocation5 + $0x30] sm:$0xff] %vm83_vm0, %v982_v57  ;;  %1661 = vmatmul.mubr.msk.f32.vlgmr.msra.gmra.mrb[12].mxu1 %vm83_vm0, %v982_v57 }
0x1392   :  { %v1103_v58 = vld [vmem:[#allocation5 + $0x30] sm:$0xff] }
0x1393   :  { %1680 = vmatprep.mubr.msk.f32.mxu0 %vm83_vm0, %v1103_v58 }
0x145e   :  { %v1056_v60 = vpop.f32.mrb[12].mxu1 }
0x145f   :  { %v1060_v20 = vadd.f32 %v1056_v60, %v230_v59  ;;  %v1662_v61 = vpop.f32.mrb[13].mxu1 }
0x1461   :  { %1814 = vtanh.f32 %v1060_v20  ;;  %v1487_v63 = vmul.f32 -1.442695, %v1060_v20 }
0x1463   :  { %1816 = vpow2.f32 %v1487_v63 }
0x146b   :  { %v1815_v62 = vpop.eup %1814 }
0x146c   :  { %1070 = vrot.lane.b32.xlu1 %v1815_v62, %s1981_s22 }
0x146d   :  { %v1817_v1 = vpop.eup %1816 }
0x146e   :  { %v1064_v2 = vadd.f32 1.0, %v1817_v1 }
0x1470   :  { %1818 = vrcp.f32 %v1064_v2 }
0x147a   :  { %v1819_v3 = vpop.eup %1818 }
0x147b   :  { %v1068_v6 = vmul.f32 %v1819_v3, %v973_v53 }
0x14de   :  { %v1071_v4 = vpop.permute.xlu1 %1070 }
0x14df   :  { %v1073_v5 = vmul.f32 %v1819_v3, %v1071_v4 }
0x14e1   :  { %1075 = vrot.lane.b32.xlu0 %v1073_v5, %s1982_s23 }
0x1553   :  { %v1076_v7 = vpop.permute.xlu0 %1075 }
0x1554   :  { %v2242_v22 = vadd.f32 %v1076_v7, %v1068_v6 }
0x1556   :  { %1820 = vtanh.f32 %v2242_v22 }
0x1560   :  { %v1821_v23 = vpop.eup %1820 }
0x1561   :  { %1081 = vrot.lane.b32.xlu1 %v1821_v23, %s1981_s22 }
0x1585   :  { %1258 = vmax.xlane.f32.xlu1 %v1249_v16 }
0x1589   :  { %1262 = vmax.xlane.f32.xlu1 %v1251_v18 }
0x158d   :  { %1266 = vmax.xlane.f32.xlu1 %v1253_v13 }
0x15d3   :  { %v1082_v14 = vpop.permute.xlu1 %1081 }
0x15d4   :  { %v1084_v15 = vmul.f32 %v1819_v3, %v1082_v14 }
0x15d6   :  { %1086 = vrot.lane.b32.xlu0 %v1084_v15, %s1982_s23 }
0x15f5   :  { %1260 = vmax.xlane.f32.xlu0 %v1250_v21 }
0x15f9   :  { %1256 = vmax.xlane.f32.xlu0 %v1248_v26 }
0x15fd   :  { %1264 = vmax.xlane.f32.xlu0 %v1252_v27 }
0x1612   :  { %v1259_v30 = vpop.xlane.xlu1 %1258 }
0x1613   :  { %v2264_v35 = vsub.f32 %v1249_v16, %v1259_v30 }
0x1615   :  { %v1282_v38 = vmul.f32 1.442695, %v2264_v35 }
0x1616   :  { %v1263_v32 = vpop.xlane.xlu1 %1262 }
0x1617   :  { %v2266_v36 = vsub.f32 %v1251_v18, %v1263_v32 }
0x1619   :  { %v1286_v42 = vmul.f32 1.442695, %v2266_v36 }
0x161a   :  { %v1267_v39 = vpop.xlane.xlu1 %1266 }
0x161b   :  { %v2273_v43 = vsub.f32 %v1253_v13, %v1267_v39 }
0x161d   :  { %v1290_v47 = vmul.f32 1.442695, %v2273_v43 }
0x1648   :  { %v1087_v28 = vpop.permute.xlu0 %1086 }
0x1649   :  { %1090 = vst.msk [vmem:[#allocation5 + $0x38] sm:$0xff] %vm83_vm0, %v1087_v28  ;;  %1091 = vst.msk [vmem:[#allocation2] sm:$0xff] %vm83_vm0, %v1087_v28 }
0x1650   :  { %v1104_v29 = vld [vmem:[#allocation5 + $0x38] sm:$0xff] }
0x1651   :  { %1681 = vmatmul.mubr.msk.f32.gmra.mrb[16].mxu0 %vm83_vm0, %v1104_v29 }
0x1682   :  { %v1261_v31 = vpop.xlane.xlu0 %1260 }
0x1683   :  { %v2262_v33 = vsub.f32 %v1250_v21, %v1261_v31 }
0x1685   :  { %v1284_v37 = vmul.f32 1.442695, %v2262_v33 }
0x1686   :  { %v1257_v34 = vpop.xlane.xlu0 %1256 }
0x1687   :  { %v2270_v40 = vsub.f32 %v1248_v26, %v1257_v34  ;;  %1822 = vpow2.f32 %v1284_v37 }
0x1688   :  { %1824 = vpow2.f32 %v1282_v38 }
0x1689   :  { %v1280_v44 = vmul.f32 1.442695, %v2270_v40  ;;  %1826 = vpow2.f32 %v1286_v42 }
0x168a   :  { %v1265_v41 = vpop.xlane.xlu0 %1264 }
0x168b   :  { %v2276_v45 = vsub.f32 %v1252_v27, %v1265_v41  ;;  %1828 = vpow2.f32 %v1280_v44 }
0x168c   :  { %1830 = vpow2.f32 %v1290_v47 }
0x168d   :  { %v1288_v49 = vmul.f32 1.442695, %v2276_v45 }
0x168f   :  { %1832 = vpow2.f32 %v1288_v49 }
0x1691   :  { %v1823_v53 = vpop.eup %1822 }
0x1692   :  { %v1825_v54 = vpop.eup %1824 }
0x1693   :  { %v1827_v55 = vpop.eup %1826 }
0x1695   :  { %v1829_v56 = vpop.eup %1828 }
0x1696   :  { %v1831_v57 = vpop.eup %1830 }
0x1699   :  { %v1833_v58 = vpop.eup %1832 }
0x1724   :  { %v1682_v46 = vpop.f32.mrb[16].mxu0 }
0x1725   :  { %v1242_v24 = vadd.f32 %v1682_v46, %v1488_v8  ;;  %v1236_v48 = vpop.f32.mrb[17].mxu0 }
0x1726   :  { %v1237_v50 = vadd.f32 %v1488_v8, %v1236_v48 }
0x1727   :  { %v1255_v51 = vsel %vm1247_vm3, %v1242_v24, -3.4028235e+38 }
0x1728   :  { %1270 = vmax.xlane.f32.xlu1 %v1255_v51  ;;  %v1254_v52 = vsel %vm1247_vm3, %v1237_v50, -3.4028235e+38 }
0x1729   :  { %1268 = vmax.xlane.f32.xlu0 %v1254_v52 }
0x172c   :  { %1300 = vadd.xlane.f32.xlu1 %v1823_v53 }
0x172d   :  { %1298 = vadd.xlane.f32.xlu0 %v1825_v54 }
0x1730   :  { %1302 = vadd.xlane.f32.xlu1 %v1827_v55 }
0x1731   :  { %1296 = vadd.xlane.f32.xlu0 %v1829_v56 }
0x1734   :  { %1306 = vadd.xlane.f32.xlu1 %v1831_v57 }
0x1735   :  { %1304 = vadd.xlane.f32.xlu0 %v1833_v58 }
0x17b5   :  { %v1271_v59 = vpop.xlane.xlu1 %1270 }
0x17b6   :  { %v2282_v60 = vsub.f32 %v1255_v51, %v1271_v59  ;;  %v1269_v20 = vpop.xlane.xlu0 %1268 }
0x17b7   :  { %v2284_v61 = vsub.f32 %v1254_v52, %v1269_v20 }
0x17b8   :  { %v1294_v62 = vmul.f32 1.442695, %v2282_v60 }
0x17b9   :  { %v1292_v63 = vmul.f32 1.442695, %v2284_v61  ;;  %v1301_v1 = vpop.xlane.xlu1 %1300 }
0x17ba   :  { %1834 = vpow2.f32 %v1294_v62  ;;  %v1299_v2 = vpop.xlane.xlu0 %1298 }
0x17bb   :  { %1836 = vpow2.f32 %v1292_v63 }
0x17bc   :  { %1838 = vlog2.f32 %v1301_v1 }
0x17bd   :  { %1840 = vlog2.f32 %v1299_v2  ;;  %v1303_v3 = vpop.xlane.xlu1 %1302 }
0x17be   :  { %1842 = vlog2.f32 %v1303_v3  ;;  %v1297_v4 = vpop.xlane.xlu0 %1296 }
0x17bf   :  { %1844 = vlog2.f32 %v1297_v4 }
0x17c1   :  { %v1307_v5 = vpop.xlane.xlu1 %1306 }
0x17c2   :  { %1846 = vlog2.f32 %v1307_v5  ;;  %v1305_v6 = vpop.xlane.xlu0 %1304 }
0x17c3   :  { %1848 = vlog2.f32 %v1305_v6 }
0x17c4   :  { %v1835_v7 = vpop.eup %1834 }
0x17c5   :  { %v1837_v23 = vpop.eup %1836  ;;  %1310 = vadd.xlane.f32.xlu1 %v1835_v7 }
0x17c6   :  { %v1839_v9 = vpop.eup %1838  ;;  %1308 = vadd.xlane.f32.xlu0 %v1837_v23 }
0x17c7   :  { %v1841_v8 = vpop.eup %1840  ;;  %v1317_v0 = vmul.f32 0.6931472, %v1839_v9 }
0x17c8   :  { %v1843_v10 = vpop.eup %1842  ;;  %v1315_v11 = vmul.f32 0.6931472, %v1841_v8 }
0x17c9   :  { %v1845_v16 = vpop.eup %1844  ;;  %v1330_v12 = vsub.f32 %v2262_v33, %v1317_v0  ;;  %v1319_v18 = vmul.f32 0.6931472, %v1843_v10 }
0x17ca   :  { %v1329_v13 = vsub.f32 %v2264_v35, %v1315_v11  ;;  %v1313_v14 = vmul.f32 0.6931472, %v1845_v16 }
0x17cb   :  { %v1347_v15 = vrot.slane %v1330_v12, 6  ;;  %v1331_v17 = vsub.f32 %v2266_v36, %v1319_v18 }
0x17cc   :  { %v1847_v19 = vpop.eup %1846  ;;  %v1344_v21 = vrot.slane %v1329_v13, 7  ;;  %v1328_v25 = vsub.f32 %v2270_v40, %v1313_v14 }
0x17cd   :  { %v1350_v26 = vrot.slane %v1331_v17, 5  ;;  %v1323_v30 = vmul.f32 0.6931472, %v1847_v19  ;;  %v1849_v31 = vpop.eup %1848 }
0x17ce   :  { %v1433_v27 = vsel %vm1345_vm4, %v1347_v15, %v1344_v21  ;;  %v1346_v28 = vsel %vm1345_vm4, %v1344_v21, %v1328_v25  ;;  %v1367_v29 = vsel %vm1348_vm5, %v1344_v21, %v1328_v25  ;;  %1442 = vst [vmem:[#allocation14 + $0x31] sm:$0x80] %v1328_v25  ;;  %v1378_v36 = vsel %vm1351_vm6, %v1344_v21, %v1328_v25 }
0x17cf   :  { %v1423_v32 = vsel %vm1345_vm4, %v1350_v26, %v1347_v15  ;;  %v1434_v33 = vsel %vm1348_vm5, %v1350_v26, %v1433_v27  ;;  %v1349_v34 = vsel %vm1348_vm5, %v1347_v15, %v1346_v28  ;;  %v1368_v35 = vsel %vm1351_vm6, %v1347_v15, %v1367_v29 }
0x17d0   :  { %v1400_v37 = vsel %vm1357_vm8, %v1344_v21, %v1328_v25  ;;  %v1411_v38 = vsel %vm1360_vm9, %v1344_v21, %v1328_v25  ;;  %v1389_v39 = vsel %vm1354_vm7, %v1344_v21, %v1328_v25  ;;  %v1422_v42 = vsel %vm1363_vm10, %v1344_v21, %v1328_v25 }
0x17d1   :  { %v1401_v40 = vsel %vm1360_vm9, %v1347_v15, %v1400_v37  ;;  %v1412_v41 = vsel %vm1363_vm10, %v1347_v15, %v1411_v38  ;;  %1431 = vst [vmem:[#allocation14 + $0x2a] sm:$0xc0] %v1422_v42  ;;  %v1321_v46 = vmul.f32 0.6931472, %v1849_v31  ;;  %v1352_v47 = vsel %vm1351_vm6, %v1350_v26, %v1349_v34 }
0x17d2   :  { %v1402_v44 = vsel %vm1363_vm10, %v1350_v26, %v1401_v40  ;;  %1420 = vst [vmem:[#allocation14 + $0x23] sm:$0xe0] %v1412_v41  ;;  %v1333_v24 = vsub.f32 %v2273_v43, %v1323_v30  ;;  %v1369_v48 = vsel %vm1354_vm7, %v1350_v26, %v1368_v35  ;;  %v1379_v49 = vsel %vm1354_vm7, %v1347_v15, %v1378_v36 }
0x17d3   :  { %1409 = vst [vmem:[#allocation14 + $0x1c] sm:$0xf0] %v1402_v44  ;;  %v1390_v50 = vsel %vm1357_vm8, %v1347_v15, %v1389_v39  ;;  %v1332_v51 = vsub.f32 %v2276_v45, %v1321_v46  ;;  %v1380_v54 = vsel %vm1357_vm8, %v1350_v26, %v1379_v49 }
0x17d4   :  { %v1356_v53 = vrot.slane %v1333_v24, 3  ;;  %v1391_v55 = vsel %vm1360_vm9, %v1350_v26, %v1390_v50 }
0x17d5   :  { %v1353_v52 = vrot.slane %v1332_v51, 4 }
0x17d7   :  { %v1355_v56 = vsel %vm1354_vm7, %v1353_v52, %v1352_v47  ;;  %v1370_v57 = vsel %vm1357_vm8, %v1353_v52, %v1369_v48  ;;  %v1381_v43 = vsel %vm1360_vm9, %v1353_v52, %v1380_v54  ;;  %v1392_v58 = vsel %vm1363_vm10, %v1353_v52, %v1391_v55 }
0x17d8   :  { %v1382_v59 = vsel %vm1363_vm10, %v1356_v53, %v1381_v43  ;;  %1398 = vst [vmem:[#allocation14 + $0x15] sm:$0xf8] %v1392_v58  ;;  %v1413_v20 = vsel %vm1345_vm4, %v1353_v52, %v1350_v26  ;;  %v1424_v45 = vsel %vm1348_vm5, %v1353_v52, %v1423_v32  ;;  %v1435_v62 = vsel %vm1351_vm6, %v1353_v52, %v1434_v33 }
0x17d9   :  { %1387 = vst [vmem:[#allocation14 + $0xe] sm:$0xfc] %v1382_v59  ;;  %v1403_v8 = vsel %vm1345_vm4, %v1356_v53, %v1353_v52  ;;  %v1371_v10 = vsel %vm1360_vm9, %v1356_v53, %v1370_v57  ;;  %v1414_v11 = vsel %vm1348_vm5, %v1356_v53, %v1413_v20  ;;  %v1425_v16 = vsel %vm1351_vm6, %v1356_v53, %v1424_v45 }
0x17da   :  { %v1436_v12 = vsel %vm1354_vm7, %v1356_v53, %v1435_v62 }
0x17dc   :  { %1093 = vrot.lane.b32.xlu0 %v2242_v22, %s1983_s5  ;;  %v1358_v22 = vsel %vm1357_vm8, %v1356_v53, %v1355_v56 }
0x1852   :  { %v1311_v63 = vpop.xlane.xlu1 %1310 }
0x1853   :  { %1850 = vlog2.f32 %v1311_v63  ;;  %v1309_v1 = vpop.xlane.xlu0 %1308 }
0x1854   :  { %1852 = vlog2.f32 %v1309_v1 }
0x1857   :  { %v1094_v2 = vpop.permute.xlu0 %1093 }
0x1858   :  { %1096 = vst.msk [vmem:[#allocation3] sm:$0xff] %vm83_vm0, %v1094_v2 }
0x185d   :  { %v1851_v3 = vpop.eup %1850 }
0x185e   :  { %v1853_v4 = vpop.eup %1852  ;;  %v1327_v5 = vmul.f32 0.6931472, %v1851_v3 }
0x185f   :  { %v1325_v6 = vmul.f32 0.6931472, %v1853_v4 }
0x1860   :  { %v1335_v7 = vsub.f32 %v2282_v60, %v1327_v5 }
0x1861   :  { %v1334_v23 = vsub.f32 %v2284_v61, %v1325_v6 }
0x1862   :  { %v1362_v9 = vrot.slane %v1335_v7, 1 }
0x1863   :  { %v1359_v0 = vrot.slane %v1334_v23, 2 }
0x1864   :  { %1377 = vst [vmem:[#allocation14 + $0xf] sm:$0x1] %v1362_v9 }
0x1865   :  { %v1361_v60 = vsel %vm1360_vm9, %v1359_v0, %v1358_v22  ;;  %v1372_v61 = vsel %vm1363_vm10, %v1359_v0, %v1371_v10  ;;  %v1383_v18 = vsel %vm1345_vm4, %v1362_v9, %v1359_v0  ;;  %v1393_v13 = vsel %vm1345_vm4, %v1359_v0, %v1356_v53 }
0x1866   :  { %v1364_v14 = vsel %vm1363_vm10, %v1362_v9, %v1361_v60  ;;  %1376 = vst [vmem:[#allocation14 + $0x7] sm:$0xfe] %v1372_v61  ;;  %1388 = vst [vmem:[#allocation14 + $0x16] sm:$0x3] %v1383_v18  ;;  %v1394_v15 = vsel %vm1348_vm5, %v1362_v9, %v1393_v13  ;;  %v1404_v17 = vsel %vm1348_vm5, %v1359_v0, %v1403_v8 }
0x1867   :  { %v1415_v19 = vsel %vm1351_vm6, %v1359_v0, %v1414_v11  ;;  %1366 = vst [vmem:[#allocation14] sm:$0xff] %v1364_v14  ;;  %1399 = vst [vmem:[#allocation14 + $0x1d] sm:$0x7] %v1394_v15  ;;  %v1405_v21 = vsel %vm1351_vm6, %v1362_v9, %v1404_v17  ;;  %v1426_v26 = vsel %vm1354_vm7, %v1359_v0, %v1425_v16 }
0x1868   :  { %v1416_v25 = vsel %vm1354_vm7, %v1362_v9, %v1415_v19  ;;  %v1437_v27 = vsel %vm1357_vm8, %v1359_v0, %v1436_v12  ;;  %1410 = vst [vmem:[#allocation14 + $0x24] sm:$0xf] %v1405_v21  ;;  %v1427_v28 = vsel %vm1357_vm8, %v1362_v9, %v1426_v26 }
0x1869   :  { %1421 = vst [vmem:[#allocation14 + $0x2b] sm:$0x1f] %v1416_v25  ;;  %v1438_v29 = vsel %vm1360_vm9, %v1362_v9, %v1437_v27  ;;  %1432 = vst [vmem:[#allocation14 + $0x32] sm:$0x3f] %v1427_v28 }
0x186a   :  { %1443 = vst [vmem:[#allocation14 + $0x39] sm:$0x7f] %v1438_v29 }
0x186b   :  { %1953 = shalt.err (!%p1950_p8)
}
0x186c   :  { %s1954_s7 = scalar_lea.hbm %s2368_s6, 1024 }
0x186d   :  { %p1955_p9 = scmp.ne.s32.totalorder %s2368_s6, %s1954_s7  ;;  %p1958_p10 = scmp.lt.u32.totalorder %s1954_s7, %s2368_s6 }
0x186f   :  { %p1960_p11 = pnand %p1958_p10, %p1955_p9 }
0x1871   :  { %1963 = shalt.err (!%p1960_p11)
}
0x1872   :  { %1455 = dma.vmem_to_hbm [thread:$0]  %s1450_s27, 1024, %s2368_s6, [#allocation8], %s1974_s9, %s1974_s9, %s1975_s10  }
0x1873   :  { %1970 = dma.done.wait [#allocation8], 1024  }
0x1874   :  { %1971 = vsyncadd [#allocation8], 4294966272 }
0x1875   :  { %1459 = vsyncpa [#allocation7], 1 }
0x1876   :  { %1460 = vsyncpa [#allocation10], 1 }
0x1877   :  { %1461 = vsyncpa [#allocation13], 1 }
0x1878   :  { %1462 = vsyncpa [#allocation8], 1 }

</bundles_post_ra>
